<compile_context>
chip_gen: v5e
topology: v5e:2x2
jax: 0.10.0
libtpu: 0.0.40
codegen_flags: <defaults>
</compile_context>

<pallas_src>
from functools import partial

import jax
import jax.numpy as jnp
from jax.experimental import pallas as pl
from jax.experimental.pallas import tpu as pltpu

HIDDEN_DIM = 32
STRIDE = 10

# ~0.35 us per grid step expressed in "rows of compute" (used by the tile chooser).
_STEP_OVERHEAD_ROWS = 1024


def _target_encoder_kernel(pc_ref, w1_ref, b1_ref, w2_ref, b2_ref, w3_ref, b3_ref,
                           out_ref, feat_scratch, *, pack, layer1_on_mxu):
    """One row tile per grid step.

    pc_ref:        (TILE, 3)                 f32
    w1/b1:         (3, 64) / (1, 64)         f32   (BN folded)
    w2/b2:         (64, 128) / (1, 128)      bf16 / f32
    w3/b3:         (128, H) / (1, H)         bf16 / f32
    out_ref:       (TILE//(STRIDE*pack), pack*H)  f32   (lane-dense packed groups)
    feat_scratch:  (TILE, H)                 f32   VMEM scratch
    """
    x = pc_ref[...]                                            # (TILE, 3)

    # Layer 1 (3 -> 64): MXU on v6e/v7x (slack at K<=128), VPU on v5e.
    if layer1_on_mxu:
        h = jnp.dot(x, w1_ref[...], preferred_element_type=jnp.float32) + b1_ref[...]
    else:
        h = (x[:, 0:1] * w1_ref[0:1, :]
             + x[:, 1:2] * w1_ref[1:2, :]
             + x[:, 2:3] * w1_ref[2:3, :]
             + b1_ref[...])
    h = jnp.maximum(h, 0.0)                                    # (TILE, 64)

    # Layers 2/3 on the MXU: bf16 operands, f32 accumulation; bias + ReLU in f32.
    h = jnp.dot(h.astype(jnp.bfloat16), w2_ref[...],
                preferred_element_type=jnp.float32) + b2_ref[...]
    h = jnp.maximum(h, 0.0)                                    # (TILE, 128)
    feat_scratch[...] = jnp.dot(h.astype(jnp.bfloat16), w3_ref[...],
                                preferred_element_type=jnp.float32) + b3_ref[...]

    # Downsample: max over each window of STRIDE consecutive points. `pack` consecutive
    # groups are written into one 128-lane output row.  Each phase j uses STRIDE
    # sublane-strided loads (stride = STRIDE*pack, a multiple of 8 -> constant sublane
    # position) reduced with a pairwise tree (depth ~4 instead of a 9-deep chain).
    g_out = out_ref.shape[0]
    hdim = feat_scratch.shape[1]
    row_stride = STRIDE * pack
    for j in range(pack):
        vals = [feat_scratch[pl.ds(j * STRIDE + k, g_out, stride=row_stride), :]
                for k in range(STRIDE)]
        while len(vals) > 1:
            nxt = [jnp.maximum(vals[i], vals[i + 1]) for i in range(0, len(vals) - 1, 2)]
            if len(vals) % 2:
                nxt.append(vals[-1])
            vals = nxt
        if pack == 1:
            out_ref[...] = vals[0]
        else:
            out_ref[:, j * hdim:(j + 1) * hdim] = vals[0]


def _layer1_on_mxu_default():
    """v6e/v7x: run the K=3 layer on the 256-wide MXU (it has slack) and relieve the VPU/XLU.
    v5e and older: keep it on the VPU (the 128-wide MXU is the busier unit there)."""
    try:
        kind = jax.devices()[0].device_kind.lower()
    except Exception:
        return True
    return not any(tag in kind for tag in ("v2", "v3", "v4", "v5"))


def _lane_pad(c):
    return -(-c // 128) * 128


def _choose_tiling(total_rows, target_rows, pack):
    """Pick (tile_rows, padded_total_rows).

    tile is a multiple of 8*STRIDE*pack (keeps both the (8,128) sublane rule for the packed
    output block and the stride windows aligned with tile boundaries), at most `target_rows`,
    and chosen to balance padding waste against per-grid-step overhead.  The total row count
    is padded up to a multiple of the tile, so VMEM stays bounded for any input size.  When
    there is enough work we force >= 2 grid steps so the parallel axis can feed both v7x
    TensorCores."""
    step = 8 * STRIDE * pack
    hi = max(step, (min(target_rows, total_rows) // step) * step)
    best = None
    t = step
    while t <= hi:
        n = -(-total_rows // t)
        if not (total_rows >= 2 * step and n < 2):
            cost = n * t + n * _STEP_OVERHEAD_ROWS
            if best is None or cost < best[0] or (cost == best[0] and t > best[1]):
                best = (cost, t, n * t)
        t += step
    assert best is not None
    _, tile, padded = best
    return tile, padded


def target_encoder(pc, params, *, tile_rows=10240, layer1_on_mxu=None):
    """pc: (B, N, 3) float32.  Returns (pc_down (B, N//STRIDE, 3),
    feat_down (B, N//STRIDE, H))."""
    w1, b1, w2, b2, w3, b3 = params
    B, N, _ = pc.shape
    # Windows must not straddle batch boundaries in the flattened layout.
    assert N % STRIDE == 0
    G = N // STRIDE
    H = w3.shape[1]
    if layer1_on_mxu is None:
        layer1_on_mxu = _layer1_on_mxu_default()

    # Lane-dense output packing: PACK consecutive groups per 128-lane output row.
    pack = 128 // H if (H <= 128 and 128 % H == 0) else 1
    pack = max(1, min(pack, 8))

    total_rows = B * N
    tile, padded = _choose_tiling(total_rows, tile_rows, pack)
    num_tiles = padded // tile
    g_out = tile // (STRIDE * pack)
    out_rows = padded // (STRIDE * pack)
    out_cols = pack * H

    pc_flat = pc.reshape(total_rows, 3)
    if padded != total_rows:
        # Zero rows form whole extra groups at the end (total_rows % STRIDE == 0); their
        # pooled outputs are sliced off below.
        pc_flat = jnp.pad(pc_flat, ((0, padded - total_rows), (0, 0)))

    w2_bf = w2.astype(jnp.bfloat16)
    w3_bf = w3.astype(jnp.bfloat16)

    flops = 2 * padded * (3 * 64 + 64 * 128 + 128 * H)
    bytes_accessed = (padded * 3 * 4
                      + out_rows * out_cols * 4
                      + (w2_bf.size + w3_bf.size) * 2
                      + (w1.size + b1.size + b2.size + b3.size) * 4)

    # VMEM budget with lane padding (last dim rounds up to 128 lanes) and double-buffered
    # input/output blocks; capped at 64 MiB so it is valid on v7x as well as v5e/v6e.
    vmem_est = (2 * tile * _lane_pad(3) * 4          # pc block, double-buffered
                + tile * _lane_pad(H) * 4            # feat scratch (f32)
                + 2 * g_out * _lane_pad(out_cols) * 4  # output block, double-buffered
                + (1 << 18))                         # weights / biases / slack
    vmem_limit = min(64 << 20, max(32 << 20, vmem_est * 3 // 2))

    grid_spec = pltpu.PrefetchScalarGridSpec(
        num_scalar_prefetch=0,
        grid=(num_tiles,),
        in_specs=[
            pl.BlockSpec((tile, 3), lambda i: (i, 0)),
            # Grid-invariant weights/biases: full-array blocks, revisited at (0, 0).
            pl.BlockSpec(w1.shape, lambda i: (0, 0)),
            pl.BlockSpec(b1.shape, lambda i: (0, 0)),
            pl.BlockSpec(w2_bf.shape, lambda i: (0, 0)),
            pl.BlockSpec(b2.shape, lambda i: (0, 0)),
            pl.BlockSpec(w3_bf.shape, lambda i: (0, 0)),
            pl.BlockSpec(b3.shape, lambda i: (0, 0)),
        ],
        out_specs=pl.BlockSpec((g_out, out_cols), lambda i: (i, 0)),
        scratch_shapes=[pltpu.VMEM((tile, H), jnp.float32)],
    )

    kernel = partial(_target_encoder_kernel, pack=pack, layer1_on_mxu=layer1_on_mxu)
    feat_packed = pl.pallas_call(
        kernel,
        out_shape=jax.ShapeDtypeStruct((out_rows, out_cols), jnp.float32),
        grid_spec=grid_spec,
        compiler_params=pltpu.CompilerParams(
            dimension_semantics=("parallel",),
            vmem_limit_bytes=int(vmem_limit)),
        cost_estimate=pl.CostEstimate(flops=flops, transcendentals=0,
                                      bytes_accessed=bytes_accessed),
    )(pc_flat, w1, b1, w2_bf, b2, w3_bf, b3)

    # Unpack lanes -> groups, drop padded groups, restore (B, G, H).
    feat_down = feat_packed.reshape(padded // STRIDE, H)[:B * G].reshape(B, G, H)
    # pc_down is pure strided data movement (last dim 3) -> let XLA do it in the wrapper.
    pc_down = pc[:, ::STRIDE, :]
    return pc_down, feat_down


def init_params(key, hidden_dim):
    """Deterministic Conv1d(k=1)+BatchNorm1d(eval) parameters, BN folded into W/b."""
    dims = [3, 64, 128, hidden_dim]
    eps = 1e-5
    params = []
    keys = jax.random.split(key, 6 * (len(dims) - 1))
    ki = 0
    for i in range(len(dims) - 1):
        cin, cout = dims[i], dims[i + 1]
        w = jax.random.normal(keys[ki], (cin, cout), jnp.float32) / jnp.sqrt(cin); ki += 1
        b = 0.01 * jax.random.normal(keys[ki], (cout,), jnp.float32); ki += 1
        gamma = 1.0 + 0.1 * jax.random.normal(keys[ki], (cout,), jnp.float32); ki += 1
        beta = 0.1 * jax.random.normal(keys[ki], (cout,), jnp.float32); ki += 1
        mean = 0.05 * jax.random.normal(keys[ki], (cout,), jnp.float32); ki += 1
        var = 1.0 + 0.1 * jnp.abs(jax.random.normal(keys[ki], (cout,), jnp.float32)); ki += 1
        scale = gamma / jnp.sqrt(var + eps)              # BN (eval) fold
        w_eff = w * scale[None, :]
        b_eff = (b - mean) * scale + beta
        params += [w_eff, b_eff[None, :]]                # bias kept 2-D (1, C) for TPU
    return tuple(params)


def target_encoder_ref(pc, params):
    """Pure-JAX f32 reference with identical assumed semantics."""
    w1, b1, w2, b2, w3, b3 = params
    h = jnp.maximum(pc @ w1 + b1, 0.0)
    h = jnp.maximum(h @ w2 + b2, 0.0)
    feat = h @ w3 + b3
    B, N, _ = pc.shape
    G = N // STRIDE
    pc_down = pc[:, ::STRIDE, :]
    feat_down = jnp.max(feat.reshape(B, G, STRIDE, -1), axis=2)
    return pc_down, feat_down


if __name__ == "__main__":
    key = jax.random.PRNGKey(0)
    k_pc, k_par, k_pc2 = jax.random.split(key, 3)
    params = init_params(k_par, HIDDEN_DIM)

    # Case 1: two grid steps (exercises the tiled/megacore path and the packed output).
    B, N = 2, 320
    pc = jax.random.normal(k_pc, (B, N, 3), jnp.float32)
    pc_down, feat_down = target_encoder(pc, params, tile_rows=320)
    jax.block_until_ready((pc_down, feat_down))
    pc_down_ref, feat_down_ref = target_encoder_ref(pc, params)
    assert pc_down.shape == (B, N // STRIDE, 3)
    assert feat_down.shape == (B, N // STRIDE, HIDDEN_DIM)
    assert jnp.allclose(pc_down, pc_down_ref, atol=1e-6, rtol=1e-6)
    # bf16 MXU operands (f32 accumulate) -> slightly loosened feature tolerance.
    assert jnp.allclose(feat_down, feat_down_ref, atol=5e-2, rtol=5e-2)

    # Case 2: row count not a multiple of the tile -> exercises the padding path.
    B2, N2 = 1, 200
    pc2 = jax.random.normal(k_pc2, (B2, N2, 3), jnp.float32)
    pc_down2, feat_down2 = target_encoder(pc2, params)          # default tile_rows
    jax.block_until_ready((pc_down2, feat_down2))
    pc_down2_ref, feat_down2_ref = target_encoder_ref(pc2, params)
    assert feat_down2.shape == (B2, N2 // STRIDE, HIDDEN_DIM)
    assert jnp.allclose(pc_down2, pc_down2_ref, atol=1e-6, rtol=1e-6)
    assert jnp.allclose(feat_down2, feat_down2_ref, atol=5e-2, rtol=5e-2)

    print("KERNEL_OK")
</pallas_src>

<mosaic_0001>
module attributes {stable_mosaic.version = 11 : i64} {
  func.func @_target_encoder_kernel(%arg0: i32, %arg1: memref<320x3xf32, #tpu.memory_space<vmem>>, %arg2: memref<3x64xf32, #tpu.memory_space<vmem>>, %arg3: memref<1x64xf32, #tpu.memory_space<vmem>>, %arg4: memref<64x128xbf16, #tpu.memory_space<vmem>>, %arg5: memref<1x128xf32, #tpu.memory_space<vmem>>, %arg6: memref<128x32xbf16, #tpu.memory_space<vmem>>, %arg7: memref<1x32xf32, #tpu.memory_space<vmem>>, %arg8: memref<8x128xf32, #tpu.memory_space<vmem>>, %arg9: memref<320x32xf32, #tpu.memory_space<vmem>>) attributes {dimension_semantics = [#tpu.dimension_semantics<parallel>], iteration_bounds = array<i64: 2>, scalar_prefetch = 0 : i64, scratch_operands = 1 : i64, tpu.core_type = #tpu.core_type<tc>, window_params = [{transform_indices = @transform_0, window_bounds = array<i64: 320, 3>}, {pipeline_mode = #tpu.pipeline_mode<synchronous>, transform_indices = @transform_1, window_bounds = array<i64: 3, 64>}, {pipeline_mode = #tpu.pipeline_mode<synchronous>, transform_indices = @transform_2, window_bounds = array<i64: 1, 64>}, {pipeline_mode = #tpu.pipeline_mode<synchronous>, transform_indices = @transform_3, window_bounds = array<i64: 64, 128>}, {pipeline_mode = #tpu.pipeline_mode<synchronous>, transform_indices = @transform_4, window_bounds = array<i64: 1, 128>}, {pipeline_mode = #tpu.pipeline_mode<synchronous>, transform_indices = @transform_5, window_bounds = array<i64: 128, 32>}, {pipeline_mode = #tpu.pipeline_mode<synchronous>, transform_indices = @transform_6, window_bounds = array<i64: 1, 32>}, {transform_indices = @transform_7, window_bounds = array<i64: 8, 128>}]} {
    %c0 = arith.constant 0 : index
    %c0_0 = arith.constant 0 : index
    %0 = vector.load %arg1[%c0, %c0_0] : memref<320x3xf32, #tpu.memory_space<vmem>>, vector<320x3xf32>
    %c0_1 = arith.constant 0 : index
    %c0_2 = arith.constant 0 : index
    %1 = vector.load %arg2[%c0_1, %c0_2] : memref<3x64xf32, #tpu.memory_space<vmem>>, vector<3x64xf32>
    %cst = arith.constant dense<0.000000e+00> : vector<320x64xf32>
    %2 = tpu.matmul %0, %1, %cst {dimension_numbers = #tpu.dot_dimension_numbers<[1], [0], [0], [1], [0, 0, 1, 1], [], []>} : vector<320x3xf32>, vector<3x64xf32>, vector<320x64xf32> -> vector<320x64xf32>
    %c0_3 = arith.constant 0 : index
    %c0_4 = arith.constant 0 : index
    %3 = vector.load %arg3[%c0_3, %c0_4] : memref<1x64xf32, #tpu.memory_space<vmem>>, vector<1x64xf32>
    %4 = vector.broadcast %3 : vector<1x64xf32> to vector<320x64xf32>
    %5 = arith.addf %2, %4 : vector<320x64xf32>
    %cst_5 = arith.constant 0.000000e+00 : f32
    %6 = vector.broadcast %cst_5 : f32 to vector<320x64xf32>
    %7 = arith.maximumf %5, %6 : vector<320x64xf32>
    %8 = arith.truncf %7 : vector<320x64xf32> to vector<320x64xbf16>
    %c0_6 = arith.constant 0 : index
    %c0_7 = arith.constant 0 : index
    %9 = vector.load %arg4[%c0_6, %c0_7] : memref<64x128xbf16, #tpu.memory_space<vmem>>, vector<64x128xbf16>
    %cst_8 = arith.constant dense<0.000000e+00> : vector<320x128xf32>
    %10 = tpu.matmul %8, %9, %cst_8 {dimension_numbers = #tpu.dot_dimension_numbers<[1], [0], [0], [1], [0, 0, 1, 1], [], []>} : vector<320x64xbf16>, vector<64x128xbf16>, vector<320x128xf32> -> vector<320x128xf32>
    %c0_9 = arith.constant 0 : index
    %c0_10 = arith.constant 0 : index
    %11 = vector.load %arg5[%c0_9, %c0_10] : memref<1x128xf32, #tpu.memory_space<vmem>>, vector<1x128xf32>
    %12 = vector.broadcast %11 : vector<1x128xf32> to vector<320x128xf32>
    %13 = arith.addf %10, %12 : vector<320x128xf32>
    %cst_11 = arith.constant 0.000000e+00 : f32
    %14 = vector.broadcast %cst_11 : f32 to vector<320x128xf32>
    %15 = arith.maximumf %13, %14 : vector<320x128xf32>
    %16 = arith.truncf %15 : vector<320x128xf32> to vector<320x128xbf16>
    %c0_12 = arith.constant 0 : index
    %c0_13 = arith.constant 0 : index
    %17 = vector.load %arg6[%c0_12, %c0_13] : memref<128x32xbf16, #tpu.memory_space<vmem>>, vector<128x32xbf16>
    %cst_14 = arith.constant dense<0.000000e+00> : vector<320x32xf32>
    %18 = tpu.matmul %16, %17, %cst_14 {dimension_numbers = #tpu.dot_dimension_numbers<[1], [0], [0], [1], [0, 0, 1, 1], [], []>} : vector<320x128xbf16>, vector<128x32xbf16>, vector<320x32xf32> -> vector<320x32xf32>
    %c0_15 = arith.constant 0 : index
    %c0_16 = arith.constant 0 : index
    %19 = vector.load %arg7[%c0_15, %c0_16] : memref<1x32xf32, #tpu.memory_space<vmem>>, vector<1x32xf32>
    %20 = vector.broadcast %19 : vector<1x32xf32> to vector<320x32xf32>
    %21 = arith.addf %18, %20 : vector<320x32xf32>
    %c0_17 = arith.constant 0 : index
    %c0_18 = arith.constant 0 : index
    %22 = vector.load %arg9[%c0_17, %c0_18] : memref<320x32xf32, #tpu.memory_space<vmem>>, vector<320x32xf32>
    tpu.vector_store %arg9[%c0_17, %c0_18], %21 {strides = array<i32>} : memref<320x32xf32, #tpu.memory_space<vmem>>, vector<320x32xf32>,
    %c0_19 = arith.constant 0 : index
    %c0_20 = arith.constant 0 : index
    %23 = tpu.strided_load %arg9[%c0_19, %c0_20] {strides = array<i32: 40, 1>} : memref<320x32xf32, #tpu.memory_space<vmem>>, vector<8x32xf32>
    %c1 = arith.constant 1 : index
    %c0_21 = arith.constant 0 : index
    %24 = tpu.strided_load %arg9[%c1, %c0_21] {strides = array<i32: 40, 1>} : memref<320x32xf32, #tpu.memory_space<vmem>>, vector<8x32xf32>
    %c2 = arith.constant 2 : index
    %c0_22 = arith.constant 0 : index
    %25 = tpu.strided_load %arg9[%c2, %c0_22] {strides = array<i32: 40, 1>} : memref<320x32xf32, #tpu.memory_space<vmem>>, vector<8x32xf32>
    %c3 = arith.constant 3 : index
    %c0_23 = arith.constant 0 : index
    %26 = tpu.strided_load %arg9[%c3, %c0_23] {strides = array<i32: 40, 1>} : memref<320x32xf32, #tpu.memory_space<vmem>>, vector<8x32xf32>
    %c4 = arith.constant 4 : index
    %c0_24 = arith.constant 0 : index
    %27 = tpu.strided_load %arg9[%c4, %c0_24] {strides = array<i32: 40, 1>} : memref<320x32xf32, #tpu.memory_space<vmem>>, vector<8x32xf32>
    %c5 = arith.constant 5 : index
    %c0_25 = arith.constant 0 : index
    %28 = tpu.strided_load %arg9[%c5, %c0_25] {strides = array<i32: 40, 1>} : memref<320x32xf32, #tpu.memory_space<vmem>>, vector<8x32xf32>
    %c6 = arith.constant 6 : index
    %c0_26 = arith.constant 0 : index
    %29 = tpu.strided_load %arg9[%c6, %c0_26] {strides = array<i32: 40, 1>} : memref<320x32xf32, #tpu.memory_space<vmem>>, vector<8x32xf32>
    %c7 = arith.constant 7 : index
    %c0_27 = arith.constant 0 : index
    %30 = tpu.strided_load %arg9[%c7, %c0_27] {strides = array<i32: 40, 1>} : memref<320x32xf32, #tpu.memory_space<vmem>>, vector<8x32xf32>
    %c8 = arith.constant 8 : index
    %c0_28 = arith.constant 0 : index
    %31 = tpu.strided_load %arg9[%c8, %c0_28] {strides = array<i32: 40, 1>} : memref<320x32xf32, #tpu.memory_space<vmem>>, vector<8x32xf32>
    %c9 = arith.constant 9 : index
    %c0_29 = arith.constant 0 : index
    %32 = tpu.strided_load %arg9[%c9, %c0_29] {strides = array<i32: 40, 1>} : memref<320x32xf32, #tpu.memory_space<vmem>>, vector<8x32xf32>
    %33 = arith.maximumf %23, %24 : vector<8x32xf32>
    %34 = arith.maximumf %25, %26 : vector<8x32xf32>
    %35 = arith.maximumf %27, %28 : vector<8x32xf32>
    %36 = arith.maximumf %29, %30 : vector<8x32xf32>
    %37 = arith.maximumf %31, %32 : vector<8x32xf32>
    %38 = arith.maximumf %33, %34 : vector<8x32xf32>
    %39 = arith.maximumf %35, %36 : vector<8x32xf32>
    %40 = arith.maximumf %38, %39 : vector<8x32xf32>
    %41 = arith.maximumf %40, %37 : vector<8x32xf32>
    %c0_30 = arith.constant 0 : index
    %c0_31 = arith.constant 0 : index
    %42 = vector.load %arg8[%c0_30, %c0_31] : memref<8x128xf32, #tpu.memory_space<vmem>>, vector<8x32xf32>
    tpu.vector_store %arg8[%c0_30, %c0_31], %41 {strides = array<i32>} : memref<8x128xf32, #tpu.memory_space<vmem>>, vector<8x32xf32>,
    %c10 = arith.constant 10 : index
    %c0_32 = arith.constant 0 : index
    %43 = tpu.strided_load %arg9[%c10, %c0_32] {strides = array<i32: 40, 1>} : memref<320x32xf32, #tpu.memory_space<vmem>>, vector<8x32xf32>
    %c11 = arith.constant 11 : index
    %c0_33 = arith.constant 0 : index
    %44 = tpu.strided_load %arg9[%c11, %c0_33] {strides = array<i32: 40, 1>} : memref<320x32xf32, #tpu.memory_space<vmem>>, vector<8x32xf32>
    %c12 = arith.constant 12 : index
    %c0_34 = arith.constant 0 : index
    %45 = tpu.strided_load %arg9[%c12, %c0_34] {strides = array<i32: 40, 1>} : memref<320x32xf32, #tpu.memory_space<vmem>>, vector<8x32xf32>
    %c13 = arith.constant 13 : index
    %c0_35 = arith.constant 0 : index
    %46 = tpu.strided_load %arg9[%c13, %c0_35] {strides = array<i32: 40, 1>} : memref<320x32xf32, #tpu.memory_space<vmem>>, vector<8x32xf32>
    %c14 = arith.constant 14 : index
    %c0_36 = arith.constant 0 : index
    %47 = tpu.strided_load %arg9[%c14, %c0_36] {strides = array<i32: 40, 1>} : memref<320x32xf32, #tpu.memory_space<vmem>>, vector<8x32xf32>
    %c15 = arith.constant 15 : index
    %c0_37 = arith.constant 0 : index
    %48 = tpu.strided_load %arg9[%c15, %c0_37] {strides = array<i32: 40, 1>} : memref<320x32xf32, #tpu.memory_space<vmem>>, vector<8x32xf32>
    %c16 = arith.constant 16 : index
    %c0_38 = arith.constant 0 : index
    %49 = tpu.strided_load %arg9[%c16, %c0_38] {strides = array<i32: 40, 1>} : memref<320x32xf32, #tpu.memory_space<vmem>>, vector<8x32xf32>
    %c17 = arith.constant 17 : index
    %c0_39 = arith.constant 0 : index
    %50 = tpu.strided_load %arg9[%c17, %c0_39] {strides = array<i32: 40, 1>} : memref<320x32xf32, #tpu.memory_space<vmem>>, vector<8x32xf32>
    %c18 = arith.constant 18 : index
    %c0_40 = arith.constant 0 : index
    %51 = tpu.strided_load %arg9[%c18, %c0_40] {strides = array<i32: 40, 1>} : memref<320x32xf32, #tpu.memory_space<vmem>>, vector<8x32xf32>
    %c19 = arith.constant 19 : index
    %c0_41 = arith.constant 0 : index
    %52 = tpu.strided_load %arg9[%c19, %c0_41] {strides = array<i32: 40, 1>} : memref<320x32xf32, #tpu.memory_space<vmem>>, vector<8x32xf32>
    %53 = arith.maximumf %43, %44 : vector<8x32xf32>
    %54 = arith.maximumf %45, %46 : vector<8x32xf32>
    %55 = arith.maximumf %47, %48 : vector<8x32xf32>
    %56 = arith.maximumf %49, %50 : vector<8x32xf32>
    %57 = arith.maximumf %51, %52 : vector<8x32xf32>
    %58 = arith.maximumf %53, %54 : vector<8x32xf32>
    %59 = arith.maximumf %55, %56 : vector<8x32xf32>
    %60 = arith.maximumf %58, %59 : vector<8x32xf32>
    %61 = arith.maximumf %60, %57 : vector<8x32xf32>
    %c0_42 = arith.constant 0 : index
    %c32 = arith.constant 32 : index
    %62 = vector.load %arg8[%c0_42, %c32] : memref<8x128xf32, #tpu.memory_space<vmem>>, vector<8x32xf32>
    tpu.vector_store %arg8[%c0_42, %c32], %61 {strides = array<i32>} : memref<8x128xf32, #tpu.memory_space<vmem>>, vector<8x32xf32>,
    %c20 = arith.constant 20 : index
    %c0_43 = arith.constant 0 : index
    %63 = tpu.strided_load %arg9[%c20, %c0_43] {strides = array<i32: 40, 1>} : memref<320x32xf32, #tpu.memory_space<vmem>>, vector<8x32xf32>
    %c21 = arith.constant 21 : index
    %c0_44 = arith.constant 0 : index
    %64 = tpu.strided_load %arg9[%c21, %c0_44] {strides = array<i32: 40, 1>} : memref<320x32xf32, #tpu.memory_space<vmem>>, vector<8x32xf32>
    %c22 = arith.constant 22 : index
    %c0_45 = arith.constant 0 : index
    %65 = tpu.strided_load %arg9[%c22, %c0_45] {strides = array<i32: 40, 1>} : memref<320x32xf32, #tpu.memory_space<vmem>>, vector<8x32xf32>
    %c23 = arith.constant 23 : index
    %c0_46 = arith.constant 0 : index
    %66 = tpu.strided_load %arg9[%c23, %c0_46] {strides = array<i32: 40, 1>} : memref<320x32xf32, #tpu.memory_space<vmem>>, vector<8x32xf32>
    %c24 = arith.constant 24 : index
    %c0_47 = arith.constant 0 : index
    %67 = tpu.strided_load %arg9[%c24, %c0_47] {strides = array<i32: 40, 1>} : memref<320x32xf32, #tpu.memory_space<vmem>>, vector<8x32xf32>
    %c25 = arith.constant 25 : index
    %c0_48 = arith.constant 0 : index
    %68 = tpu.strided_load %arg9[%c25, %c0_48] {strides = array<i32: 40, 1>} : memref<320x32xf32, #tpu.memory_space<vmem>>, vector<8x32xf32>
    %c26 = arith.constant 26 : index
    %c0_49 = arith.constant 0 : index
    %69 = tpu.strided_load %arg9[%c26, %c0_49] {strides = array<i32: 40, 1>} : memref<320x32xf32, #tpu.memory_space<vmem>>, vector<8x32xf32>
    %c27 = arith.constant 27 : index
    %c0_50 = arith.constant 0 : index
    %70 = tpu.strided_load %arg9[%c27, %c0_50] {strides = array<i32: 40, 1>} : memref<320x32xf32, #tpu.memory_space<vmem>>, vector<8x32xf32>
    %c28 = arith.constant 28 : index
    %c0_51 = arith.constant 0 : index
    %71 = tpu.strided_load %arg9[%c28, %c0_51] {strides = array<i32: 40, 1>} : memref<320x32xf32, #tpu.memory_space<vmem>>, vector<8x32xf32>
    %c29 = arith.constant 29 : index
    %c0_52 = arith.constant 0 : index
    %72 = tpu.strided_load %arg9[%c29, %c0_52] {strides = array<i32: 40, 1>} : memref<320x32xf32, #tpu.memory_space<vmem>>, vector<8x32xf32>
    %73 = arith.maximumf %63, %64 : vector<8x32xf32>
    %74 = arith.maximumf %65, %66 : vector<8x32xf32>
    %75 = arith.maximumf %67, %68 : vector<8x32xf32>
    %76 = arith.maximumf %69, %70 : vector<8x32xf32>
    %77 = arith.maximumf %71, %72 : vector<8x32xf32>
    %78 = arith.maximumf %73, %74 : vector<8x32xf32>
    %79 = arith.maximumf %75, %76 : vector<8x32xf32>
    %80 = arith.maximumf %78, %79 : vector<8x32xf32>
    %81 = arith.maximumf %80, %77 : vector<8x32xf32>
    %c0_53 = arith.constant 0 : index
    %c64 = arith.constant 64 : index
    %82 = vector.load %arg8[%c0_53, %c64] : memref<8x128xf32, #tpu.memory_space<vmem>>, vector<8x32xf32>
    tpu.vector_store %arg8[%c0_53, %c64], %81 {strides = array<i32>} : memref<8x128xf32, #tpu.memory_space<vmem>>, vector<8x32xf32>,
    %c30 = arith.constant 30 : index
    %c0_54 = arith.constant 0 : index
    %83 = tpu.strided_load %arg9[%c30, %c0_54] {strides = array<i32: 40, 1>} : memref<320x32xf32, #tpu.memory_space<vmem>>, vector<8x32xf32>
    %c31 = arith.constant 31 : index
    %c0_55 = arith.constant 0 : index
    %84 = tpu.strided_load %arg9[%c31, %c0_55] {strides = array<i32: 40, 1>} : memref<320x32xf32, #tpu.memory_space<vmem>>, vector<8x32xf32>
    %c32_56 = arith.constant 32 : index
    %c0_57 = arith.constant 0 : index
    %85 = tpu.strided_load %arg9[%c32_56, %c0_57] {strides = array<i32: 40, 1>} : memref<320x32xf32, #tpu.memory_space<vmem>>, vector<8x32xf32>
    %c33 = arith.constant 33 : index
    %c0_58 = arith.constant 0 : index
    %86 = tpu.strided_load %arg9[%c33, %c0_58] {strides = array<i32: 40, 1>} : memref<320x32xf32, #tpu.memory_space<vmem>>, vector<8x32xf32>
    %c34 = arith.constant 34 : index
    %c0_59 = arith.constant 0 : index
    %87 = tpu.strided_load %arg9[%c34, %c0_59] {strides = array<i32: 40, 1>} : memref<320x32xf32, #tpu.memory_space<vmem>>, vector<8x32xf32>
    %c35 = arith.constant 35 : index
    %c0_60 = arith.constant 0 : index
    %88 = tpu.strided_load %arg9[%c35, %c0_60] {strides = array<i32: 40, 1>} : memref<320x32xf32, #tpu.memory_space<vmem>>, vector<8x32xf32>
    %c36 = arith.constant 36 : index
    %c0_61 = arith.constant 0 : index
    %89 = tpu.strided_load %arg9[%c36, %c0_61] {strides = array<i32: 40, 1>} : memref<320x32xf32, #tpu.memory_space<vmem>>, vector<8x32xf32>
    %c37 = arith.constant 37 : index
    %c0_62 = arith.constant 0 : index
    %90 = tpu.strided_load %arg9[%c37, %c0_62] {strides = array<i32: 40, 1>} : memref<320x32xf32, #tpu.memory_space<vmem>>, vector<8x32xf32>
    %c38 = arith.constant 38 : index
    %c0_63 = arith.constant 0 : index
    %91 = tpu.strided_load %arg9[%c38, %c0_63] {strides = array<i32: 40, 1>} : memref<320x32xf32, #tpu.memory_space<vmem>>, vector<8x32xf32>
    %c39 = arith.constant 39 : index
    %c0_64 = arith.constant 0 : index
    %92 = tpu.strided_load %arg9[%c39, %c0_64] {strides = array<i32: 40, 1>} : memref<320x32xf32, #tpu.memory_space<vmem>>, vector<8x32xf32>
    %93 = arith.maximumf %83, %84 : vector<8x32xf32>
    %94 = arith.maximumf %85, %86 : vector<8x32xf32>
    %95 = arith.maximumf %87, %88 : vector<8x32xf32>
    %96 = arith.maximumf %89, %90 : vector<8x32xf32>
    %97 = arith.maximumf %91, %92 : vector<8x32xf32>
    %98 = arith.maximumf %93, %94 : vector<8x32xf32>
    %99 = arith.maximumf %95, %96 : vector<8x32xf32>
    %100 = arith.maximumf %98, %99 : vector<8x32xf32>
    %101 = arith.maximumf %100, %97 : vector<8x32xf32>
    %c0_65 = arith.constant 0 : index
    %c96 = arith.constant 96 : index
    %102 = vector.load %arg8[%c0_65, %c96] : memref<8x128xf32, #tpu.memory_space<vmem>>, vector<8x32xf32>
    tpu.vector_store %arg8[%c0_65, %c96], %101 {strides = array<i32>} : memref<8x128xf32, #tpu.memory_space<vmem>>, vector<8x32xf32>,
    return
  }
  func.func @transform_0(%arg0: i32) -> (i32, i32) {
    %c0_i32 = arith.constant 0 : i32
    %c0_i32_0 = arith.constant 0 : i32
    return %arg0, %c0_i32 : i32, i32
  }
  func.func @transform_1(%arg0: i32) -> (i32, i32) {
    %c0_i32 = arith.constant 0 : i32
    %c0_i32_0 = arith.constant 0 : i32
    %c0_i32_1 = arith.constant 0 : i32
    return %c0_i32, %c0_i32_0 : i32, i32
  }
  func.func @transform_2(%arg0: i32) -> (i32, i32) {
    %c0_i32 = arith.constant 0 : i32
    %c0_i32_0 = arith.constant 0 : i32
    %c0_i32_1 = arith.constant 0 : i32
    return %c0_i32, %c0_i32_0 : i32, i32
  }
  func.func @transform_3(%arg0: i32) -> (i32, i32) {
    %c0_i32 = arith.constant 0 : i32
    %c0_i32_0 = arith.constant 0 : i32
    %c0_i32_1 = arith.constant 0 : i32
    return %c0_i32, %c0_i32_0 : i32, i32
  }
  func.func @transform_4(%arg0: i32) -> (i32, i32) {
    %c0_i32 = arith.constant 0 : i32
    %c0_i32_0 = arith.constant 0 : i32
    %c0_i32_1 = arith.constant 0 : i32
    return %c0_i32, %c0_i32_0 : i32, i32
  }
  func.func @transform_5(%arg0: i32) -> (i32, i32) {
    %c0_i32 = arith.constant 0 : i32
    %c0_i32_0 = arith.constant 0 : i32
    %c0_i32_1 = arith.constant 0 : i32
    return %c0_i32, %c0_i32_0 : i32, i32
  }
  func.func @transform_6(%arg0: i32) -> (i32, i32) {
    %c0_i32 = arith.constant 0 : i32
    %c0_i32_0 = arith.constant 0 : i32
    %c0_i32_1 = arith.constant 0 : i32
    return %c0_i32, %c0_i32_0 : i32, i32
  }
  func.func @transform_7(%arg0: i32) -> (i32, i32) {
    %c0_i32 = arith.constant 0 : i32
    %c0_i32_0 = arith.constant 0 : i32
    return %arg0, %c0_i32 : i32, i32
  }
}

</mosaic_0001>

<bundles_post_ra>
// kernel: tpu_custom_call.1
= control target key start
LH: loop header
LB: loop body
LE: loop exit
PB: predicated region body
PF: predicated region fallthrough
CT: control target
= control target key end

     0   :  { %12 = vsyncpa [#allocation4], 0  ;;  %s2128_s0 = inlined_call_operand.vmem [shape: f32[640,3], index: 0, kind: input, shape index: {}]   ;;  %s2129_s1 = inlined_call_operand.vmem [shape: f32[3,64], index: 1, kind: input, shape index: {}]   ;;  %s2130_s2 = inlined_call_operand.vmem [shape: f32[1,64], index: 2, kind: input, shape index: {}]   ;;  %s2131_s3 = inlined_call_operand.vmem [shape: bf16[64,128], index: 3, kind: input, shape index: {}]   ;;  %s2132_s4 = inlined_call_operand.vmem [shape: f32[1,128], index: 4, kind: input, shape index: {}]   ;;  %s2133_s5 = inlined_call_operand.vmem [shape: bf16[128,32], index: 5, kind: input, shape index: {}]   ;;  %s2134_s6 = inlined_call_operand.vmem [shape: f32[1,32], index: 6, kind: input, shape index: {}]   ;;  %s2135_s7 = inlined_call_operand.hbm [shape: f32[16,128], index: 7, kind: output, shape index: {}]  }
   0x1   :  { %14 = vsyncpa [#allocation4 + $0x1], 0  ;;  %s1716_s24 = smov 0   ;;  %s1718_s25 = smov 0  }
   0x2   :  { %s1720_s26 = smov 0   ;;  %s1722_s27 = smov 0  }
   0x3 LB: > { %s1737_s28 = sadd.s32 4294967295, %s1671_s27   ;;  %s1420_s29 = sadd.s32 4294967294, %s1671_s27   ;;  %s1671_s27 = sphi %s1722_s27, %s2141_s27   ;;  %s1667_s26 = sphi %s1720_s26, %s2140_s26   ;;  %s1663_s25 = sphi %s1718_s25, %s2139_s25   ;;  %s1659_s24 = sphi %s1716_s24, %s2138_s24  }
   0x4   : > { %s1741_s30 = sadd.s32 1, %s1671_s27   ;;  %s179_s8 = sadd.s32 1, %s1667_s26 }
   0x5   : > { %s176_s9 = ssub.s32 %s1671_s27, %s1741_s30  ;;  %p189_p0 = scmp.ne.s32.totalorder %s1667_s26, %s1663_s25 }
   0x6   : > { %p177_p1 = scmp.eq.s32.totalorder %s176_s9, 0  ;;  %p190_p2 = scmp.eq.s32.totalorder %s1737_s28, 1 }
   0x7   : > { %p195_p3 = scmp.ne.s32.totalorder %s1663_s25, %s1659_s24  ;;  %p196_p4 = scmp.eq.s32.totalorder %s1420_s29, 1 }
   0x8   : > { %s1752_s10 = scalar_select %p177_p1, %s1667_s26, %s179_s8  }
   0x9   : > { %p1754_p5 = por %p190_p2, %p189_p0  ;;  %p1758_p6 = por %p196_p4, %p195_p3 }
   0xa   : > { %p1423_p7 = scmp.ge.s32.totalorder %s1671_s27, 1  ;;  %p241_p8 = scmp.lt.s32.totalorder %s1671_s27, 3 }
   0xc   : > { %p242_p9 = pnand %p1423_p7, %p241_p8 }
   0xd   : > { %s273_s15 = smul.u32 (!%p242_p9), 40, %s1737_s28  ;;  %s270_s23 = sand.u32 (!%p242_p9), 1, %s1663_s25  }
   0xe   : > { %245 = sbr.rel (%p242_p9) target bundleno = 893 (0x37d), region = 48  ;;  %s1424_s29 = sshll.u32 (!%p242_p9), %s270_s23, 3 }
   0xf   : > { %p274_p10 = scmp.lt.s32.totalorder (!%p242_p9), %s273_s15, 79  ;;  %s2085_s8 = scalar_lea.vmem (!%p242_p9), [#allocation3], %s1424_s29 }
  0x10   : > { %s1673_s9 = smov (!%p242_p9), 32   ;;  %s1674_s13 = smov (!%p242_p9), 64  }
  0x11   : > { %s1675_s14 = smov (!%p242_p9), 96   ;;  %s1358_s20 = sshll.u32 (!%p242_p9), %s2085_s8, 4  ;;  %s1359_s20 = int_to_ptr.vmem [resolvable:$true] %s1358_s20 }
  0x13   : > { %v320_v0 = vld [vmem:[%s2129_s1] sm:$0x7]  ;;  %vm446_vm0 = vcmask 1042432   ;;  %s2143_s15 = smov (!%p274_p10, %s273_s15), 79  ;;  %vm325_vm1 = vcmask 23552   ;;  %v1542_v13 = vld [vmem:[%s2131_s3 + $0x18] sm:$0xff] }
  0x14   : > { %1426 = vmatpush.msk.msra.mxu0 %vm446_vm0, %v320_v0  ;;  %1551 = vmatpush.msk.msra.mxu3 %vm446_vm0, %v320_v0  ;;  %s1425_s16 = sshll.u32 %s2143_s15, 3  ;;  %v1541_v15 = vld [vmem:[%s2131_s3 + $0x10] sm:$0xff]  ;;  %v1540_v16 = vld [vmem:[%s2131_s3 + $0x8] sm:$0xff]  ;;  %v1539_v18 = vld [vmem:[%s2131_s3] sm:$0xff]  ;;  %vm683_vm2 = vcmask 523264   ;;  %vm1090_vm3 = vcmask 261120  }
  0x15   : > { %s1771_s19 = scalar_lea.vmem %s2128_s0, %s1425_s16  ;;  %748 = vmatpush.bf16.msra.mxu1 %v1542_v13  ;;  %v1821_v23 = vld [vmem:[%s2130_s2] ss:$0 sm:$0xff]  ;;  %vm1233_vm4 = vcmask 523520   ;;  %vm1288_vm5 = vcmask 785920   ;;  %s1536_s15 = sshll.u32 %s1737_s28, 3  ;;  %vm1343_vm6 = vcmask 1048320  }
  0x16   : > { %v280_v1 = vld [vmem:[%s1771_s19] sm:$0xff]  ;;  %v281_v2 = vld [vmem:[%s1771_s19 + $0x8] sm:$0xff]  ;;  %v282_v3 = vld [vmem:[%s1771_s19 + $0x10] sm:$0xff]  ;;  %1552 = vmatpush.bf16.msrb.mxu3 %v1542_v13  ;;  %s1356_s18 = scalar_lea.hbm %s2135_s7, %s1536_s15 }
  0x17   : > { %1427 = vmatmul.msk.f32.vlgmr.msra.gmra.mxu0 %vm325_vm1, %v280_v1  ;;  %v283_v4 = vld [vmem:[%s1771_s19 + $0x18] sm:$0xff]  ;;  %v284_v5 = vld [vmem:[%s1771_s19 + $0x20] sm:$0xff]  ;;  %v285_v6 = vld [vmem:[%s1771_s19 + $0x28] sm:$0xff]  ;;  %s1360_s21 = sshll.u32 %s1356_s18, 4  ;;  %s1361_s21 = int_to_ptr.hbm [resolvable:$true] %s1360_s21 }
  0x18   : > { %v286_v7 = vld [vmem:[%s1771_s19 + $0x30] sm:$0xff]  ;;  %v287_v8 = vld [vmem:[%s1771_s19 + $0x38] sm:$0xff]  ;;  %v288_v9 = vld [vmem:[%s1771_s19 + $0x40] sm:$0xff]  ;;  %s1623_s22 = sshra.s32 %s1361_s21, 4  ;;  %s1624_s22 = int_to_ptr.hbm [resolvable:$true] %s1623_s22 }
  0x19   : > { %v289_v10 = vld [vmem:[%s1771_s19 + $0x48] sm:$0xff]  ;;  %v290_v11 = vld [vmem:[%s1771_s19 + $0x50] sm:$0xff]  ;;  %v291_v12 = vld [vmem:[%s1771_s19 + $0x58] sm:$0xff]  ;;  %749 = vmatpush.bf16.msra.mxu1 %v1541_v15  ;;  %s1625_s29 = scalar_lea.hbm %s1624_s22, 8  ;;  %p1630_p0 = scmp.lt.s32.totalorder %s1624_s22, %s2135_s7 }
  0x1a   : > { %v292_v14 = vld [vmem:[%s1771_s19 + $0x60] sm:$0xff]  ;;  %1553 = vmatpush.bf16.msrb.mxu3 %v1541_v15  ;;  %v293_v17 = vld [vmem:[%s1771_s19 + $0x68] sm:$0xff]  ;;  %v294_v19 = vld [vmem:[%s1771_s19 + $0x70] sm:$0xff]  ;;  %p1626_p11 = scmp.ne.s32.totalorder %s1624_s22, %s1625_s29 }
  0x1b   : > { %v295_v20 = vld [vmem:[%s1771_s19 + $0x78] sm:$0xff]  ;;  %v296_v22 = vld [vmem:[%s1771_s19 + $0x80] sm:$0xff]  ;;  %v297_v26 = vld [vmem:[%s1771_s19 + $0x88] sm:$0xff] }
  0x1c   : > { %v298_v32 = vld [vmem:[%s1771_s19 + $0x90] sm:$0xff]  ;;  %v299_v35 = vld [vmem:[%s1771_s19 + $0x98] sm:$0xff]  ;;  %v300_v41 = vld [vmem:[%s1771_s19 + $0xa0] sm:$0xff]  ;;  %p1627_p12 = pnand %p1626_p11, %p1754_p5 }
  0x1d   : > { %750 = vmatpush.bf16.msra.mxu1 %v1540_v16  ;;  %v301_v44 = vld [vmem:[%s1771_s19 + $0xa8] sm:$0xff]  ;;  %v302_v50 = vld [vmem:[%s1771_s19 + $0xb0] sm:$0xff]  ;;  %v303_v53 = vld [vmem:[%s1771_s19 + $0xb8] sm:$0xff] }
  0x1e   : > { %1554 = vmatpush.bf16.msrb.mxu3 %v1540_v16  ;;  %v304_v59 = vld [vmem:[%s1771_s19 + $0xc0] sm:$0xff]  ;;  %v305_v62 = vld [vmem:[%s1771_s19 + $0xc8] sm:$0xff]  ;;  %v1549_v15 = vld [vmem:[%s2133_s5 + $0x30] sm:$0xff]  ;;  %p1628_p13 = pneg %p1627_p12 }
  0x1f   : > { %1428 = vmatmul.msk.f32.gmra.mxu0 %vm325_vm1, %v281_v2  ;;  %v313_v13 = vld [vmem:[%s1771_s19 + $0x108] sm:$0xff] }
  0x21   : > { %751 = vmatpush.bf16.msra.mxu1 %v1539_v18 }
  0x22   : > { %1555 = vmatpush.bf16.msrb.mxu3 %v1539_v18  ;;  %v1548_v18 = vld [vmem:[%s2133_s5 + $0x28] sm:$0xff] }
  0x27   : > { %1429 = vmatmul.msk.f32.gmra.mxu0 %vm325_vm1, %v282_v3 }
  0x2f   : > { %1430 = vmatmul.msk.f32.gmra.mxu0 %vm325_vm1, %v283_v4  ;;  %v306_v4 = vld [vmem:[%s1771_s19 + $0xd0] sm:$0xff] }
  0x37   : > { %1431 = vmatmul.msk.f32.gmra.mxu0 %vm325_vm1, %v284_v5  ;;  %v312_v5 = vld [vmem:[%s1771_s19 + $0x100] sm:$0xff] }
  0x38   : > { %1459 = vmatmul.msk.f32.vlgmr.msra.gmra.mxu3 %vm325_vm1, %v312_v5 }
  0x3f   : > { %1432 = vmatmul.msk.f32.gmra.mxu0 %vm325_vm1, %v285_v6 }
  0x40   : > { %1460 = vmatmul.msk.f32.gmra.mxu3 %vm325_vm1, %v313_v13 }
  0x47   : > { %1433 = vmatmul.msk.f32.gmra.mxu0 %vm325_vm1, %v286_v7 }
  0x4f   : > { %1434 = vmatmul.msk.f32.gmra.mxu0 %vm325_vm1, %v287_v8  ;;  %v307_v8 = vld [vmem:[%s1771_s19 + $0xd8] sm:$0xff] }
  0x57   : > { %1435 = vmatmul.msk.f32.gmra.mxu0 %vm325_vm1, %v288_v9 }
  0x5f   : > { %1436 = vmatmul.msk.f32.gmra.mxu0 %vm325_vm1, %v289_v10  ;;  %v1550_v10 = vld [vmem:[%s2133_s5 + $0x38] sm:$0xff] }
  0x60   : > { %981 = vmatpush.bf16.msra.mxu2 %v1550_v10  ;;  %1556 = vmatpush.bf16.msra.mxu3 %v1550_v10 }
  0x64   : > { %982 = vmatpush.bf16.msra.mxu2 %v1549_v15  ;;  %1557 = vmatpush.bf16.msra.mxu3 %v1549_v15 }
  0x67   : > { %1437 = vmatmul.msk.f32.gmra.mxu0 %vm325_vm1, %v290_v11 }
  0x68   : > { %983 = vmatpush.bf16.msra.mxu2 %v1548_v18  ;;  %1558 = vmatpush.bf16.msra.mxu3 %v1548_v18 }
  0x6f   : > { %1438 = vmatmul.msk.f32.gmra.mxu0 %vm325_vm1, %v291_v12 }
  0x77   : > { %1439 = vmatmul.msk.f32.gmra.mxu0 %vm325_vm1, %v292_v14 }
  0x7f   : > { %1440 = vmatmul.msk.f32.gmra.mxu0 %vm325_vm1, %v293_v17  ;;  %v308_v17 = vld [vmem:[%s1771_s19 + $0xe0] sm:$0xff] }
  0x87   : > { %1441 = vmatmul.msk.f32.gmra.mxu0 %vm325_vm1, %v294_v19  ;;  %v314_v19 = vld [vmem:[%s1771_s19 + $0x110] sm:$0xff] }
  0x88   : > { %1461 = vmatmul.msk.f32.gmra.mxu3 %vm325_vm1, %v314_v19 }
  0x8f   : > { %1442 = vmatmul.msk.f32.gmra.mxu0 %vm325_vm1, %v295_v20  ;;  %v1547_v20 = vld [vmem:[%s2133_s5 + $0x20] sm:$0xff] }
  0x90   : > { %984 = vmatpush.bf16.msra.mxu2 %v1547_v20  ;;  %1559 = vmatpush.bf16.msra.mxu3 %v1547_v20 }
  0x94   : > { %v467_v21 = vpop.f32.mrf.mxu0 }
  0x95   : > { %v468_v24 = vadd.f32 %v1821_v23, %v467_v21 }
  0x97   : > { %1443 = vmatmul.msk.f32.gmra.mxu0 %vm325_vm1, %v296_v22  ;;  %v587_v28 = vmax.f32 %v468_v24, 0.0  ;;  %v309_v24 = vld [vmem:[%s1771_s19 + $0xe8] sm:$0xff] }
  0x9c   : > { %v470_v25 = vpop.f32.mrf.mxu0 }
  0x9d   : > { %v471_v27 = vadd.f32 %v1821_v23, %v470_v25 }
  0x9f   : > { %v588_v29 = vmax.f32 %v471_v27, 0.0  ;;  %1444 = vmatmul.msk.f32.gmra.mxu0 %vm325_vm1, %v297_v26  ;;  %v1546_v26 = vld [vmem:[%s2133_s5 + $0x18] sm:$0xff] }
  0xa0   : > { %985 = vmatpush.bf16.msra.mxu2 %v1546_v26  ;;  %1560 = vmatpush.bf16.msra.mxu3 %v1546_v26 }
  0xa1   : > { %v627_v30 = vpack.c.bf16 %v588_v29, %v587_v28  ;;  %v315_v29 = vld [vmem:[%s1771_s19 + $0x118] sm:$0xff] }
  0xa2   : > { %1462 = vmatmul.msk.f32.gmra.mxu3 %vm325_vm1, %v315_v29 }
  0xa3   : > { %1483 = vmatmul.msk.bf16.vlgmr.msra.gmra.mxu1 %vm683_vm2, %v627_v30 }
  0xa4   : > { %v473_v31 = vpop.f32.mrf.mxu0 }
  0xa5   : > { %v474_v33 = vadd.f32 %v1821_v23, %v473_v31  ;;  %v1545_v31 = vld [vmem:[%s2133_s5 + $0x10] sm:$0xff] }
  0xa6   : > { %986 = vmatpush.bf16.msra.mxu2 %v1545_v31  ;;  %1561 = vmatpush.bf16.msra.mxu3 %v1545_v31 }
  0xa7   : > { %1445 = vmatmul.msk.f32.gmra.mxu0 %vm325_vm1, %v298_v32  ;;  %v589_v37 = vmax.f32 %v474_v33, 0.0  ;;  %v310_v33 = vld [vmem:[%s1771_s19 + $0xf0] sm:$0xff] }
  0xac   : > { %v476_v34 = vpop.f32.mrf.mxu0 }
  0xad   : > { %v477_v36 = vadd.f32 %v1821_v23, %v476_v34  ;;  %v1544_v34 = vld [vmem:[%s2133_s5 + $0x8] sm:$0xff] }
  0xae   : > { %987 = vmatpush.bf16.msra.mxu2 %v1544_v34  ;;  %1562 = vmatpush.bf16.msra.mxu3 %v1544_v34 }
  0xaf   : > { %v590_v38 = vmax.f32 %v477_v36, 0.0  ;;  %1446 = vmatmul.msk.f32.gmra.mxu0 %vm325_vm1, %v299_v35  ;;  %v316_v35 = vld [vmem:[%s1771_s19 + $0x120] sm:$0xff] }
  0xb0   : > { %1463 = vmatmul.msk.f32.gmra.mxu3 %vm325_vm1, %v316_v35  ;;  %v1543_v36 = vld [vmem:[%s2133_s5] sm:$0xff] }
  0xb1   : > { %v628_v39 = vpack.c.bf16 %v590_v38, %v589_v37 }
  0xb2   : > { %988 = vmatpush.bf16.msra.mxu2 %v1543_v36  ;;  %1563 = vmatpush.bf16.msra.mxu3 %v1543_v36 }
  0xb3   : > { %1484 = vmatmul.msk.bf16.gmra.mxu1 %vm683_vm2, %v628_v39  ;;  %v311_v39 = vld [vmem:[%s1771_s19 + $0xf8] sm:$0xff] }
  0xb4   : > { %v479_v40 = vpop.f32.mrf.mxu0 }
  0xb5   : > { %v480_v42 = vadd.f32 %v1821_v23, %v479_v40 }
  0xb7   : > { %1447 = vmatmul.msk.f32.gmra.mxu0 %vm325_vm1, %v300_v41  ;;  %v591_v46 = vmax.f32 %v480_v42, 0.0 }
  0xbc   : > { %v482_v43 = vpop.f32.mrf.mxu0 }
  0xbd   : > { %v483_v45 = vadd.f32 %v1821_v23, %v482_v43  ;;  %v317_v43 = vld [vmem:[%s1771_s19 + $0x128] sm:$0xff] }
  0xbe   : > { %1464 = vmatmul.msk.f32.gmra.mxu3 %vm325_vm1, %v317_v43 }
  0xbf   : > { %v592_v47 = vmax.f32 %v483_v45, 0.0  ;;  %1448 = vmatmul.msk.f32.gmra.mxu0 %vm325_vm1, %v301_v44 }
  0xc1   : > { %v629_v48 = vpack.c.bf16 %v592_v47, %v591_v46  ;;  %v318_v46 = vld [vmem:[%s1771_s19 + $0x130] sm:$0xff] }
  0xc3   : > { %1485 = vmatmul.msk.bf16.gmra.mxu1 %vm683_vm2, %v629_v48 }
  0xc4   : > { %v485_v49 = vpop.f32.mrf.mxu0 }
  0xc5   : > { %v486_v51 = vadd.f32 %v1821_v23, %v485_v49 }
  0xc6   : > { %1465 = vmatmul.msk.f32.gmra.mxu3 %vm325_vm1, %v318_v46 }
  0xc7   : > { %1449 = vmatmul.msk.f32.gmra.mxu0 %vm325_vm1, %v302_v50  ;;  %v593_v55 = vmax.f32 %v486_v51, 0.0 }
  0xcc   : > { %v488_v52 = vpop.f32.mrf.mxu0 }
  0xcd   : > { %v489_v54 = vadd.f32 %v1821_v23, %v488_v52 }
  0xcf   : > { %v594_v56 = vmax.f32 %v489_v54, 0.0  ;;  %1450 = vmatmul.msk.f32.gmra.mxu0 %vm325_vm1, %v303_v53  ;;  %v319_v53 = vld [vmem:[%s1771_s19 + $0x138] sm:$0xff]  ;;  %s1346_s19 = scalar_lea.sflag [#allocation4], %s270_s23 }
  0xd0   : > { %1466 = vmatmul.msk.f32.gmra.mxu3 %vm325_vm1, %v319_v53 }
  0xd1   : > { %v630_v57 = vpack.c.bf16 %v594_v56, %v593_v55  ;;  %v1923_v55 = vld [vmem:[%s2132_s4] ss:$0 sm:$0xff] }
  0xd3   : > { %1486 = vmatmul.msk.bf16.gmra.mxu1 %vm683_vm2, %v630_v57 }
  0xd4   : > { %v491_v58 = vpop.f32.mrf.mxu0 }
  0xd5   : > { %v492_v60 = vadd.f32 %v1821_v23, %v491_v58 }
  0xd7   : > { %1451 = vmatmul.msk.f32.gmra.mxu0 %vm325_vm1, %v304_v59  ;;  %v595_v0 = vmax.f32 %v492_v60, 0.0 }
  0xdc   : > { %v494_v61 = vpop.f32.mrf.mxu0 }
  0xdd   : > { %v495_v63 = vadd.f32 %v1821_v23, %v494_v61 }
  0xdf   : > { %v596_v1 = vmax.f32 %v495_v63, 0.0  ;;  %1452 = vmatmul.msk.f32.gmra.mxu0 %vm325_vm1, %v305_v62 }
  0xe1   : > { %v631_v2 = vpack.c.bf16 %v596_v1, %v595_v0 }
  0xe3   : > { %1487 = vmatmul.msk.bf16.gmra.mxu1 %vm683_vm2, %v631_v2 }
  0xe4   : > { %v497_v3 = vpop.f32.mrf.mxu0 }
  0xe5   : > { %v498_v6 = vadd.f32 %v1821_v23, %v497_v3 }
  0xe7   : > { %1453 = vmatmul.msk.f32.gmra.mxu0 %vm325_vm1, %v306_v4  ;;  %v597_v11 = vmax.f32 %v498_v6, 0.0 }
  0xec   : > { %v500_v7 = vpop.f32.mrf.mxu0 }
  0xed   : > { %v501_v9 = vadd.f32 %v1821_v23, %v500_v7 }
  0xef   : > { %v598_v12 = vmax.f32 %v501_v9, 0.0  ;;  %1454 = vmatmul.msk.f32.gmra.mxu0 %vm325_vm1, %v307_v8 }
  0xf1   : > { %v632_v14 = vpack.c.bf16 %v598_v12, %v597_v11 }
  0xf3   : > { %1488 = vmatmul.msk.bf16.gmra.mxu1 %vm683_vm2, %v632_v14 }
  0xf4   : > { %v503_v16 = vpop.f32.mrf.mxu0 }
  0xf5   : > { %v504_v21 = vadd.f32 %v1821_v23, %v503_v16 }
  0xf7   : > { %1455 = vmatmul.msk.f32.gmra.mxu0 %vm325_vm1, %v308_v17  ;;  %v599_v27 = vmax.f32 %v504_v21, 0.0 }
  0xfc   : > { %v506_v22 = vpop.f32.mrf.mxu0 }
  0xfd   : > { %v507_v25 = vadd.f32 %v1821_v23, %v506_v22 }
  0xff   : > { %v600_v28 = vmax.f32 %v507_v25, 0.0  ;;  %1456 = vmatmul.msk.f32.gmra.mxu0 %vm325_vm1, %v309_v24 }
 0x101   : > { %v633_v30 = vpack.c.bf16 %v600_v28, %v599_v27 }
 0x103   : > { %1489 = vmatmul.msk.bf16.gmra.mxu1 %vm683_vm2, %v633_v30 }
 0x104   : > { %v509_v32 = vpop.f32.mrf.mxu0 }
 0x105   : > { %v510_v37 = vadd.f32 %v1821_v23, %v509_v32 }
 0x107   : > { %1457 = vmatmul.msk.f32.gmra.mxu0 %vm325_vm1, %v310_v33  ;;  %v601_v41 = vmax.f32 %v510_v37, 0.0 }
 0x10c   : > { %v512_v38 = vpop.f32.mrf.mxu0 }
 0x10d   : > { %v513_v40 = vadd.f32 %v1821_v23, %v512_v38 }
 0x10f   : > { %v602_v42 = vmax.f32 %v513_v40, 0.0  ;;  %1458 = vmatmul.msk.f32.gmra.mxu0 %vm325_vm1, %v311_v39 }
 0x111   : > { %v634_v44 = vpack.c.bf16 %v602_v42, %v601_v41 }
 0x113   : > { %1490 = vmatmul.msk.bf16.gmra.mxu1 %vm683_vm2, %v634_v44 }
 0x114   : > { %v515_v45 = vpop.f32.mrf.mxu0 }
 0x115   : > { %v516_v47 = vadd.f32 %v1821_v23, %v515_v45 }
 0x117   : > { %v603_v50 = vmax.f32 %v516_v47, 0.0 }
 0x11c   : > { %v518_v48 = vpop.f32.mrf.mxu0 }
 0x11d   : > { %v519_v49 = vadd.f32 %v1821_v23, %v518_v48 }
 0x11f   : > { %v604_v51 = vmax.f32 %v519_v49, 0.0 }
 0x120   : > { %v753_v52 = vpop.f32.mrf.mxu1 }
 0x121   : > { %v635_v54 = vpack.c.bf16 %v604_v51, %v603_v50  ;;  %v754_v57 = vadd.f32 %v1923_v55, %v753_v52 }
 0x123   : > { %1491 = vmatmul.msk.bf16.gmra.mxu1 %vm683_vm2, %v635_v54  ;;  %v853_v60 = vmax.f32 %v754_v57, 0.0 }
 0x124   : > { %v521_v56 = vpop.f32.mrf.mxu0 }
 0x125   : > { %v522_v61 = vadd.f32 %v1821_v23, %v521_v56 }
 0x127   : > { %v605_v2 = vmax.f32 %v522_v61, 0.0 }
 0x128   : > { %v755_v58 = vpop.f32.mrf.mxu1 }
 0x129   : > { %v756_v59 = vadd.f32 %v1923_v55, %v755_v58 }
 0x12b   : > { %v854_v62 = vmax.f32 %v756_v59, 0.0 }
 0x12c   : > { %v524_v63 = vpop.f32.mrf.mxu0 }
 0x12d   : > { %v525_v0 = vadd.f32 %v1821_v23, %v524_v63  ;;  %v893_v1 = vpack.c.bf16 %v854_v62, %v853_v60 }
 0x12f   : > { %v606_v3 = vmax.f32 %v525_v0, 0.0  ;;  %989 = vmatmul.bf16.vlgmr.msra.gmra.mxu2 %v893_v1 }
 0x130   : > { %v758_v4 = vpop.f32.mrf.mxu1 }
 0x131   : > { %v636_v5 = vpack.c.bf16 %v606_v3, %v605_v2  ;;  %v759_v7 = vadd.f32 %v1923_v55, %v758_v4 }
 0x133   : > { %1492 = vmatmul.msk.bf16.gmra.mxu1 %vm683_vm2, %v636_v5  ;;  %v855_v10 = vmax.f32 %v759_v7, 0.0 }
 0x134   : > { %v527_v6 = vpop.f32.mrf.mxu0 }
 0x135   : > { %v528_v11 = vadd.f32 %v1821_v23, %v527_v6 }
 0x137   : > { %v607_v16 = vmax.f32 %v528_v11, 0.0 }
 0x138   : > { %v760_v8 = vpop.f32.mrf.mxu1 }
 0x139   : > { %v761_v9 = vadd.f32 %v1923_v55, %v760_v8 }
 0x13b   : > { %v856_v12 = vmax.f32 %v761_v9, 0.0 }
 0x13c   : > { %v530_v13 = vpop.f32.mrf.mxu0 }
 0x13d   : > { %v531_v14 = vadd.f32 %v1821_v23, %v530_v13  ;;  %v894_v15 = vpack.c.bf16 %v856_v12, %v855_v10  ;;  %v563_v13 = vpop.f32.mrf.mxu3 }
 0x13f   : > { %v608_v17 = vmax.f32 %v531_v14, 0.0  ;;  %994 = vmatmul.bf16.gmra.mxu2 %v894_v15 }
 0x140   : > { %v763_v18 = vpop.f32.mrf.mxu1 }
 0x141   : > { %v637_v19 = vpack.c.bf16 %v608_v17, %v607_v16  ;;  %v764_v21 = vadd.f32 %v1923_v55, %v763_v18 }
 0x143   : > { %1493 = vmatmul.msk.bf16.gmra.mxu1 %vm683_vm2, %v637_v19  ;;  %v857_v25 = vmax.f32 %v764_v21, 0.0 }
 0x144   : > { %v533_v20 = vpop.f32.mrf.mxu0 }
 0x145   : > { %v534_v26 = vadd.f32 %v1821_v23, %v533_v20  ;;  %v566_v19 = vpop.f32.mrf.mxu3 }
 0x147   : > { %v609_v31 = vmax.f32 %v534_v26, 0.0 }
 0x148   : > { %v765_v22 = vpop.f32.mrf.mxu1 }
 0x149   : > { %v766_v24 = vadd.f32 %v1923_v55, %v765_v22 }
 0x14b   : > { %v858_v27 = vmax.f32 %v766_v24, 0.0 }
 0x14c   : > { %v536_v28 = vpop.f32.mrf.mxu0 }
 0x14d   : > { %v537_v29 = vadd.f32 %v1821_v23, %v536_v28  ;;  %v895_v30 = vpack.c.bf16 %v858_v27, %v857_v25 }
 0x14f   : > { %v610_v32 = vmax.f32 %v537_v29, 0.0  ;;  %999 = vmatmul.bf16.gmra.mxu2 %v895_v30 }
 0x150   : > { %v768_v33 = vpop.f32.mrf.mxu1 }
 0x151   : > { %v638_v34 = vpack.c.bf16 %v610_v32, %v609_v31  ;;  %v769_v36 = vadd.f32 %v1923_v55, %v768_v33  ;;  %v569_v31 = vpop.f32.mrf.mxu3 }
 0x153   : > { %1494 = vmatmul.msk.bf16.gmra.mxu1 %vm683_vm2, %v638_v34  ;;  %v859_v39 = vmax.f32 %v769_v36, 0.0  ;;  %v564_v34 = vadd.f32 %v1821_v23, %v563_v13 }
 0x154   : > { %v539_v35 = vpop.f32.mrf.mxu0 }
 0x155   : > { %v540_v40 = vadd.f32 %v1821_v23, %v539_v35  ;;  %v567_v35 = vadd.f32 %v1821_v23, %v566_v19 }
 0x157   : > { %v611_v45 = vmax.f32 %v540_v40, 0.0  ;;  %v620_v40 = vmax.f32 %v567_v35, 0.0 }
 0x158   : > { %v770_v37 = vpop.f32.mrf.mxu1 }
 0x159   : > { %v771_v38 = vadd.f32 %v1923_v55, %v770_v37 }
 0x15b   : > { %v860_v41 = vmax.f32 %v771_v38, 0.0 }
 0x15c   : > { %v542_v42 = vpop.f32.mrf.mxu0 }
 0x15d   : > { %v543_v43 = vadd.f32 %v1821_v23, %v542_v42  ;;  %v896_v44 = vpack.c.bf16 %v860_v41, %v859_v39  ;;  %v619_v39 = vmax.f32 %v564_v34, 0.0  ;;  %v572_v42 = vpop.f32.mrf.mxu3 }
 0x15f   : > { %v612_v46 = vmax.f32 %v543_v43, 0.0  ;;  %1004 = vmatmul.bf16.gmra.mxu2 %v896_v44  ;;  %v643_v44 = vpack.c.bf16 %v620_v40, %v619_v39 }
 0x160   : > { %v773_v47 = vpop.f32.mrf.mxu1 }
 0x161   : > { %v639_v48 = vpack.c.bf16 %v612_v46, %v611_v45  ;;  %v774_v50 = vadd.f32 %v1923_v55, %v773_v47 }
 0x163   : > { %1495 = vmatmul.msk.bf16.gmra.mxu1 %vm683_vm2, %v639_v48  ;;  %v861_v53 = vmax.f32 %v774_v50, 0.0  ;;  %v570_v48 = vadd.f32 %v1821_v23, %v569_v31 }
 0x164   : > { %v545_v49 = vpop.f32.mrf.mxu0 }
 0x165   : > { %v546_v54 = vadd.f32 %v1821_v23, %v545_v49  ;;  %v575_v47 = vpop.f32.mrf.mxu3  ;;  %v573_v49 = vadd.f32 %v1821_v23, %v572_v42 }
 0x167   : > { %v613_v60 = vmax.f32 %v546_v54, 0.0  ;;  %v622_v54 = vmax.f32 %v573_v49, 0.0 }
 0x168   : > { %v775_v51 = vpop.f32.mrf.mxu1 }
 0x169   : > { %v776_v52 = vadd.f32 %v1923_v55, %v775_v51 }
 0x16b   : > { %v862_v56 = vmax.f32 %v776_v52, 0.0 }
 0x16c   : > { %v548_v57 = vpop.f32.mrf.mxu0 }
 0x16d   : > { %v549_v58 = vadd.f32 %v1821_v23, %v548_v57  ;;  %v897_v59 = vpack.c.bf16 %v862_v56, %v861_v53  ;;  %v621_v53 = vmax.f32 %v570_v48, 0.0  ;;  %v1973_v57 = vld [vmem:[%s2134_s6] ss:$0 sm:$0xff] }
 0x16f   : > { %v614_v61 = vmax.f32 %v549_v58, 0.0  ;;  %1009 = vmatmul.bf16.gmra.mxu2 %v897_v59  ;;  %v644_v59 = vpack.c.bf16 %v622_v54, %v621_v53 }
 0x170   : > { %v778_v62 = vpop.f32.mrf.mxu1 }
 0x171   : > { %v640_v63 = vpack.c.bf16 %v614_v61, %v613_v60  ;;  %v779_v1 = vadd.f32 %v1923_v55, %v778_v62  ;;  %v578_v61 = vpop.f32.mrf.mxu3 }
 0x173   : > { %1496 = vmatmul.msk.bf16.gmra.mxu1 %vm683_vm2, %v640_v63  ;;  %v863_v4 = vmax.f32 %v779_v1, 0.0  ;;  %v576_v1 = vadd.f32 %v1821_v23, %v575_v47 }
 0x174   : > { %v551_v0 = vpop.f32.mrf.mxu0 }
 0x175   : > { %v552_v5 = vadd.f32 %v1821_v23, %v551_v0 }
 0x177   : > { %v615_v10 = vmax.f32 %v552_v5, 0.0 }
 0x178   : > { %v780_v2 = vpop.f32.mrf.mxu1 }
 0x179   : > { %v781_v3 = vadd.f32 %v1923_v55, %v780_v2  ;;  %v579_v2 = vadd.f32 %v1821_v23, %v578_v61 }
 0x17b   : > { %v864_v6 = vmax.f32 %v781_v3, 0.0 }
 0x17c   : > { %v554_v7 = vpop.f32.mrf.mxu0 }
 0x17d   : > { %v555_v8 = vadd.f32 %v1821_v23, %v554_v7  ;;  %v898_v9 = vpack.c.bf16 %v864_v6, %v863_v4 }
 0x17f   : > { %v616_v11 = vmax.f32 %v555_v8, 0.0  ;;  %1014 = vmatmul.bf16.gmra.mxu2 %v898_v9  ;;  %v581_v8 = vpop.f32.mrf.mxu3  ;;  %v623_v9 = vmax.f32 %v576_v1, 0.0 }
 0x180   : > { %v783_v12 = vpop.f32.mrf.mxu1  ;;  %v582_v19 = vadd.f32 %v1821_v23, %v581_v8 }
 0x181   : > { %v641_v14 = vpack.c.bf16 %v616_v11, %v615_v10  ;;  %v784_v16 = vadd.f32 %v1923_v55, %v783_v12  ;;  %v624_v10 = vmax.f32 %v579_v2, 0.0 }
 0x183   : > { %1497 = vmatmul.msk.bf16.gmra.mxu1 %vm683_vm2, %v641_v14  ;;  %v865_v20 = vmax.f32 %v784_v16, 0.0  ;;  %v645_v13 = vpack.c.bf16 %v624_v10, %v623_v9 }
 0x184   : > { %v557_v15 = vpop.f32.mrf.mxu0 }
 0x185   : > { %v558_v21 = vadd.f32 %v1821_v23, %v557_v15 }
 0x187   : > { %v617_v27 = vmax.f32 %v558_v21, 0.0  ;;  %v584_v16 = vpop.f32.mrf.mxu3 }
 0x188   : > { %v785_v17 = vpop.f32.mrf.mxu1 }
 0x189   : > { %v786_v18 = vadd.f32 %v1923_v55, %v785_v17 }
 0x18b   : > { %v866_v22 = vmax.f32 %v786_v18, 0.0 }
 0x18c   : > { %v560_v24 = vpop.f32.mrf.mxu0 }
 0x18d   : > { %v561_v25 = vadd.f32 %v1821_v23, %v560_v24  ;;  %v899_v26 = vpack.c.bf16 %v866_v22, %v865_v20  ;;  %v585_v20 = vadd.f32 %v1821_v23, %v584_v16 }
 0x18f   : > { %v618_v28 = vmax.f32 %v561_v25, 0.0  ;;  %1019 = vmatmul.bf16.gmra.mxu2 %v899_v26 }
 0x190   : > { %v788_v29 = vpop.f32.mrf.mxu1 }
 0x191   : > { %v642_v30 = vpack.c.bf16 %v618_v28, %v617_v27  ;;  %v789_v32 = vadd.f32 %v1923_v55, %v788_v29  ;;  %v625_v27 = vmax.f32 %v582_v19, 0.0  ;;  %v626_v28 = vmax.f32 %v585_v20, 0.0 }
 0x193   : > { %1498 = vmatmul.msk.bf16.vlgmr.msrb.gmra.mxu3 %vm683_vm2, %v642_v30  ;;  %v867_v37 = vmax.f32 %v789_v32, 0.0  ;;  %v646_v31 = vpack.c.bf16 %v626_v28, %v625_v27 }
 0x198   : > { %v790_v33 = vpop.f32.mrf.mxu1 }
 0x199   : > { %v791_v36 = vadd.f32 %v1923_v55, %v790_v33 }
 0x19b   : > { %v868_v38 = vmax.f32 %v791_v36, 0.0 }
 0x19d   : > { %v900_v41 = vpack.c.bf16 %v868_v38, %v867_v37 }
 0x19f   : > { %1024 = vmatmul.bf16.gmra.mxu2 %v900_v41 }
 0x1a0   : > { %v793_v43 = vpop.f32.mrf.mxu1 }
 0x1a1   : > { %v794_v45 = vadd.f32 %v1923_v55, %v793_v43 }
 0x1a3   : > { %1499 = vmatmul.msk.bf16.gmra.mxu3 %vm683_vm2, %v643_v44  ;;  %v869_v51 = vmax.f32 %v794_v45, 0.0 }
 0x1a8   : > { %v795_v46 = vpop.f32.mrf.mxu1 }
 0x1a9   : > { %v796_v50 = vadd.f32 %v1923_v55, %v795_v46 }
 0x1ab   : > { %v870_v52 = vmax.f32 %v796_v50, 0.0 }
 0x1ad   : > { %v901_v56 = vpack.c.bf16 %v870_v52, %v869_v51 }
 0x1af   : > { %1029 = vmatmul.bf16.gmra.mxu2 %v901_v56 }
 0x1b0   : > { %v798_v58 = vpop.f32.mrf.mxu1 }
 0x1b1   : > { %v799_v63 = vadd.f32 %v1923_v55, %v798_v58 }
 0x1b2   : > { %v990_v60 = vpop.f32.mrf.mxu2 }
 0x1b3   : > { %v991_v62 = vadd.f32 %v1973_v57, %v990_v60  ;;  %1500 = vmatmul.msk.bf16.gmra.mxu3 %vm683_vm2, %v644_v59  ;;  %v871_v5 = vmax.f32 %v799_v63, 0.0 }
 0x1b5   : > { %1091 = vst.msk [vmem:[#allocation2] sm:$0xff] %vm1090_vm3, %v991_v62 }
 0x1b8   : > { %v800_v0 = vpop.f32.mrf.mxu1 }
 0x1b9   : > { %v801_v3 = vadd.f32 %v1923_v55, %v800_v0 }
 0x1ba   : > { %v992_v4 = vpop.f32.mrf.mxu2 }
 0x1bb   : > { %v872_v6 = vmax.f32 %v801_v3, 0.0  ;;  %v993_v7 = vadd.f32 %v1973_v57, %v992_v4 }
 0x1bd   : > { %1092 = vst.msk [vmem:[#allocation2 + $0x8] sm:$0xff] %vm1090_vm3, %v993_v7  ;;  %v902_v11 = vpack.c.bf16 %v872_v6, %v871_v5 }
 0x1bf   : > { %1034 = vmatmul.bf16.gmra.mxu2 %v902_v11 }
 0x1c0   : > { %v803_v12 = vpop.f32.mrf.mxu1 }
 0x1c1   : > { %v804_v17 = vadd.f32 %v1923_v55, %v803_v12 }
 0x1c2   : > { %v995_v14 = vpop.f32.mrf.mxu2 }
 0x1c3   : > { %v996_v15 = vadd.f32 %v1973_v57, %v995_v14  ;;  %1501 = vmatmul.msk.bf16.gmra.mxu3 %vm683_vm2, %v645_v13  ;;  %v873_v24 = vmax.f32 %v804_v17, 0.0 }
 0x1c5   : > { %1093 = vst.msk [vmem:[#allocation2 + $0x10] sm:$0xff] %vm1090_vm3, %v996_v15 }
 0x1c8   : > { %v805_v18 = vpop.f32.mrf.mxu1 }
 0x1c9   : > { %v806_v21 = vadd.f32 %v1923_v55, %v805_v18 }
 0x1ca   : > { %v997_v22 = vpop.f32.mrf.mxu2 }
 0x1cb   : > { %v874_v25 = vmax.f32 %v806_v21, 0.0  ;;  %v998_v26 = vadd.f32 %v1973_v57, %v997_v22 }
 0x1cd   : > { %1094 = vst.msk [vmem:[#allocation2 + $0x18] sm:$0xff] %vm1090_vm3, %v998_v26  ;;  %v903_v29 = vpack.c.bf16 %v874_v25, %v873_v24 }
 0x1cf   : > { %1039 = vmatmul.bf16.gmra.mxu2 %v903_v29 }
 0x1d0   : > { %v808_v30 = vpop.f32.mrf.mxu1 }
 0x1d1   : > { %v809_v23 = vadd.f32 %v1923_v55, %v808_v30 }
 0x1d2   : > { %v1000_v32 = vpop.f32.mrf.mxu2 }
 0x1d3   : > { %v1001_v33 = vadd.f32 %v1973_v57, %v1000_v32  ;;  %1502 = vmatmul.msk.bf16.gmra.mxu3 %vm683_vm2, %v646_v31  ;;  %v875_v37 = vmax.f32 %v809_v23, 0.0 }
 0x1d5   : > { %1095 = vst.msk [vmem:[#allocation2 + $0x20] sm:$0xff] %vm1090_vm3, %v1001_v33 }
 0x1d8   : > { %v810_v34 = vpop.f32.mrf.mxu1 }
 0x1d9   : > { %v811_v35 = vadd.f32 %v1923_v55, %v810_v34 }
 0x1da   : > { %v1002_v36 = vpop.f32.mrf.mxu2 }
 0x1db   : > { %v876_v38 = vmax.f32 %v811_v35, 0.0  ;;  %v1003_v39 = vadd.f32 %v1973_v57, %v1002_v36 }
 0x1dd   : > { %1096 = vst.msk [vmem:[#allocation2 + $0x28] sm:$0xff] %vm1090_vm3, %v1003_v39  ;;  %v904_v40 = vpack.c.bf16 %v876_v38, %v875_v37 }
 0x1df   : > { %1044 = vmatmul.bf16.gmra.mxu2 %v904_v40 }
 0x1e0   : > { %v813_v41 = vpop.f32.mrf.mxu1 }
 0x1e1   : > { %v814_v44 = vadd.f32 %v1923_v55, %v813_v41 }
 0x1e2   : > { %v1005_v42 = vpop.f32.mrf.mxu2 }
 0x1e3   : > { %v1006_v43 = vadd.f32 %v1973_v57, %v1005_v42  ;;  %v877_v48 = vmax.f32 %v814_v44, 0.0 }
 0x1e5   : > { %1097 = vst.msk [vmem:[#allocation2 + $0x30] sm:$0xff] %vm1090_vm3, %v1006_v43 }
 0x1e8   : > { %v815_v45 = vpop.f32.mrf.mxu1 }
 0x1e9   : > { %v816_v46 = vadd.f32 %v1923_v55, %v815_v45 }
 0x1ea   : > { %v1007_v47 = vpop.f32.mrf.mxu2 }
 0x1eb   : > { %v878_v49 = vmax.f32 %v816_v46, 0.0  ;;  %v1008_v50 = vadd.f32 %v1973_v57, %v1007_v47 }
 0x1ed   : > { %v905_v51 = vpack.c.bf16 %v878_v49, %v877_v48  ;;  %1098 = vst.msk [vmem:[#allocation2 + $0x38] sm:$0xff] %vm1090_vm3, %v1008_v50 }
 0x1ef   : > { %1049 = vmatmul.bf16.gmra.mxu2 %v905_v51 }
 0x1f0   : > { %v818_v52 = vpop.f32.mrf.mxu1 }
 0x1f1   : > { %v819_v56 = vadd.f32 %v1923_v55, %v818_v52 }
 0x1f2   : > { %v1010_v53 = vpop.f32.mrf.mxu2 }
 0x1f3   : > { %v1011_v54 = vadd.f32 %v1973_v57, %v1010_v53  ;;  %v879_v61 = vmax.f32 %v819_v56, 0.0 }
 0x1f5   : > { %1099 = vst.msk [vmem:[#allocation2 + $0x40] sm:$0xff] %vm1090_vm3, %v1011_v54 }
 0x1f8   : > { %v820_v58 = vpop.f32.mrf.mxu1 }
 0x1f9   : > { %v821_v59 = vadd.f32 %v1923_v55, %v820_v58 }
 0x1fa   : > { %v1012_v60 = vpop.f32.mrf.mxu2 }
 0x1fb   : > { %v880_v62 = vmax.f32 %v821_v59, 0.0  ;;  %v1013_v63 = vadd.f32 %v1973_v57, %v1012_v60 }
 0x1fd   : > { %v906_v0 = vpack.c.bf16 %v880_v62, %v879_v61  ;;  %1100 = vst.msk [vmem:[#allocation2 + $0x48] sm:$0xff] %vm1090_vm3, %v1013_v63 }
 0x1ff   : > { %1054 = vmatmul.bf16.gmra.mxu2 %v906_v0 }
 0x200   : > { %v823_v1 = vpop.f32.mrf.mxu1 }
 0x201   : > { %v824_v4 = vadd.f32 %v1923_v55, %v823_v1 }
 0x202   : > { %v1015_v2 = vpop.f32.mrf.mxu2 }
 0x203   : > { %v1016_v3 = vadd.f32 %v1973_v57, %v1015_v2  ;;  %v881_v8 = vmax.f32 %v824_v4, 0.0 }
 0x205   : > { %1101 = vst.msk [vmem:[#allocation2 + $0x50] sm:$0xff] %vm1090_vm3, %v1016_v3 }
 0x208   : > { %v825_v5 = vpop.f32.mrf.mxu1 }
 0x209   : > { %v826_v6 = vadd.f32 %v1923_v55, %v825_v5 }
 0x20a   : > { %v1017_v7 = vpop.f32.mrf.mxu2 }
 0x20b   : > { %v882_v9 = vmax.f32 %v826_v6, 0.0  ;;  %v1018_v10 = vadd.f32 %v1973_v57, %v1017_v7 }
 0x20d   : > { %v907_v11 = vpack.c.bf16 %v882_v9, %v881_v8  ;;  %1102 = vst.msk [vmem:[#allocation2 + $0x58] sm:$0xff] %vm1090_vm3, %v1018_v10 }
 0x20f   : > { %1059 = vmatmul.bf16.vlgmr.msra.gmra.mxu3 %v907_v11 }
 0x212   : > { %v1020_v12 = vpop.f32.mrf.mxu2 }
 0x213   : > { %v1021_v13 = vadd.f32 %v1973_v57, %v1020_v12 }
 0x215   : > { %1103 = vst.msk [vmem:[#allocation2 + $0x60] sm:$0xff] %vm1090_vm3, %v1021_v13 }
 0x216   : > { %v828_v14 = vpop.f32.mrf.mxu3 }
 0x217   : > { %v829_v17 = vadd.f32 %v1923_v55, %v828_v14 }
 0x219   : > { %v883_v20 = vmax.f32 %v829_v17, 0.0 }
 0x21a   : > { %v1022_v15 = vpop.f32.mrf.mxu2 }
 0x21b   : > { %v1023_v16 = vadd.f32 %v1973_v57, %v1022_v15 }
 0x21d   : > { %1104 = vst.msk [vmem:[#allocation2 + $0x68] sm:$0xff] %vm1090_vm3, %v1023_v16 }
 0x21e   : > { %v830_v18 = vpop.f32.mrf.mxu3 }
 0x21f   : > { %v831_v19 = vadd.f32 %v1923_v55, %v830_v18 }
 0x221   : > { %v884_v21 = vmax.f32 %v831_v19, 0.0 }
 0x222   : > { %v1025_v22 = vpop.f32.mrf.mxu2 }
 0x223   : > { %v1026_v24 = vadd.f32 %v1973_v57, %v1025_v22  ;;  %v908_v25 = vpack.c.bf16 %v884_v21, %v883_v20 }
 0x225   : > { %1105 = vst.msk [vmem:[#allocation2 + $0x70] sm:$0xff] %vm1090_vm3, %v1026_v24  ;;  %1064 = vmatmul.bf16.gmra.mxu3 %v908_v25 }
 0x226   : > { %v833_v26 = vpop.f32.mrf.mxu3 }
 0x227   : > { %v834_v29 = vadd.f32 %v1923_v55, %v833_v26 }
 0x229   : > { %v885_v32 = vmax.f32 %v834_v29, 0.0 }
 0x22a   : > { %v1027_v27 = vpop.f32.mrf.mxu2 }
 0x22b   : > { %v1028_v28 = vadd.f32 %v1973_v57, %v1027_v27 }
 0x22d   : > { %1106 = vst.msk [vmem:[#allocation2 + $0x78] sm:$0xff] %vm1090_vm3, %v1028_v28 }
 0x22e   : > { %v835_v30 = vpop.f32.mrf.mxu3 }
 0x22f   : > { %v836_v31 = vadd.f32 %v1923_v55, %v835_v30 }
 0x231   : > { %v886_v33 = vmax.f32 %v836_v31, 0.0 }
 0x232   : > { %v1030_v23 = vpop.f32.mrf.mxu2 }
 0x233   : > { %v1031_v34 = vadd.f32 %v1973_v57, %v1030_v23  ;;  %v909_v35 = vpack.c.bf16 %v886_v33, %v885_v32 }
 0x235   : > { %1107 = vst.msk [vmem:[#allocation2 + $0x80] sm:$0xff] %vm1090_vm3, %v1031_v34  ;;  %1069 = vmatmul.bf16.gmra.mxu3 %v909_v35  ;;  %v1131_v34 = vld [vmem:[#allocation2] ss:$40 sm:$0xf] }
 0x236   : > { %v838_v36 = vpop.f32.mrf.mxu3  ;;  %v1135_v35 = vld [vmem:[#allocation2 + $0x1] ss:$40 sm:$0xf] }
 0x237   : > { %v839_v39 = vadd.f32 %v1923_v55, %v838_v36 }
 0x239   : > { %v887_v42 = vmax.f32 %v839_v39, 0.0  ;;  %v1143_v39 = vld [vmem:[#allocation2 + $0x3] ss:$40 sm:$0xf] }
 0x23a   : > { %v1032_v37 = vpop.f32.mrf.mxu2 }
 0x23b   : > { %v1033_v38 = vadd.f32 %v1973_v57, %v1032_v37 }
 0x23d   : > { %1108 = vst.msk [vmem:[#allocation2 + $0x88] sm:$0xff] %vm1090_vm3, %v1033_v38  ;;  %v1139_v38 = vld [vmem:[#allocation2 + $0x2] ss:$40 sm:$0xf] }
 0x23e   : > { %v840_v40 = vpop.f32.mrf.mxu3 }
 0x23f   : > { %v841_v41 = vadd.f32 %v1923_v55, %v840_v40  ;;  %v1147_v40 = vld [vmem:[#allocation2 + $0x4] ss:$40 sm:$0xf] }
 0x241   : > { %v888_v43 = vmax.f32 %v841_v41, 0.0 }
 0x242   : > { %v1035_v44 = vpop.f32.mrf.mxu2 }
 0x243   : > { %v910_v45 = vpack.c.bf16 %v888_v43, %v887_v42  ;;  %v1036_v46 = vadd.f32 %v1973_v57, %v1035_v44  ;;  %v1151_v42 = vld [vmem:[#allocation2 + $0x5] ss:$40 sm:$0xf]  ;;  %v1155_v43 = vld [vmem:[#allocation2 + $0x6] ss:$40 sm:$0xf] }
 0x245   : > { %1109 = vst.msk [vmem:[#allocation2 + $0x90] sm:$0xff] %vm1090_vm3, %v1036_v46  ;;  %1074 = vmatmul.bf16.gmra.mxu3 %v910_v45 }
 0x246   : > { %v843_v47 = vpop.f32.mrf.mxu3 }
 0x247   : > { %v844_v50 = vadd.f32 %v1923_v55, %v843_v47 }
 0x249   : > { %v889_v53 = vmax.f32 %v844_v50, 0.0 }
 0x24a   : > { %v1037_v48 = vpop.f32.mrf.mxu2 }
 0x24b   : > { %v1038_v49 = vadd.f32 %v1973_v57, %v1037_v48 }
 0x24d   : > { %1110 = vst.msk [vmem:[#allocation2 + $0x98] sm:$0xff] %vm1090_vm3, %v1038_v49 }
 0x24e   : > { %v845_v51 = vpop.f32.mrf.mxu3 }
 0x24f   : > { %v846_v52 = vadd.f32 %v1923_v55, %v845_v51 }
 0x251   : > { %v890_v54 = vmax.f32 %v846_v52, 0.0 }
 0x252   : > { %v1040_v56 = vpop.f32.mrf.mxu2 }
 0x253   : > { %v911_v58 = vpack.c.bf16 %v890_v54, %v889_v53  ;;  %v1041_v59 = vadd.f32 %v1973_v57, %v1040_v56 }
 0x255   : > { %1111 = vst.msk [vmem:[#allocation2 + $0xa0] sm:$0xff] %vm1090_vm3, %v1041_v59  ;;  %1079 = vmatmul.bf16.gmra.mxu3 %v911_v58  ;;  %v1159_v58 = vld [vmem:[#allocation2 + $0x7] ss:$40 sm:$0xf] }
 0x256   : > { %v848_v60 = vpop.f32.mrf.mxu3 }
 0x257   : > { %v849_v63 = vadd.f32 %v1923_v55, %v848_v60 }
 0x259   : > { %v891_v2 = vmax.f32 %v849_v63, 0.0 }
 0x25a   : > { %v1042_v61 = vpop.f32.mrf.mxu2 }
 0x25b   : > { %v1043_v62 = vadd.f32 %v1973_v57, %v1042_v61 }
 0x25d   : > { %1112 = vst.msk [vmem:[#allocation2 + $0xa8] sm:$0xff] %vm1090_vm3, %v1043_v62 }
 0x25e   : > { %v850_v0 = vpop.f32.mrf.mxu3 }
 0x25f   : > { %v851_v1 = vadd.f32 %v1923_v55, %v850_v0 }
 0x261   : > { %v892_v3 = vmax.f32 %v851_v1, 0.0 }
 0x262   : > { %v1045_v4 = vpop.f32.mrf.mxu2 }
 0x263   : > { %v912_v5 = vpack.c.bf16 %v892_v3, %v891_v2  ;;  %v1046_v6 = vadd.f32 %v1973_v57, %v1045_v4  ;;  %v1181_v3 = vld [vmem:[#allocation2 + $0xa] ss:$40 sm:$0xf]  ;;  %v1185_v4 = vld [vmem:[#allocation2 + $0xb] ss:$40 sm:$0xf] }
 0x265   : > { %1113 = vst.msk [vmem:[#allocation2 + $0xb0] sm:$0xff] %vm1090_vm3, %v1046_v6  ;;  %1084 = vmatmul.bf16.gmra.mxu3 %v912_v5  ;;  %v1163_v6 = vld [vmem:[#allocation2 + $0x8] ss:$40 sm:$0xf] }
 0x26a   : > { %v1047_v7 = vpop.f32.mrf.mxu2 }
 0x26b   : > { %v1048_v8 = vadd.f32 %v1973_v57, %v1047_v7  ;;  %v1189_v7 = vld [vmem:[#allocation2 + $0xc] ss:$40 sm:$0xf] }
 0x26d   : > { %1114 = vst.msk [vmem:[#allocation2 + $0xb8] sm:$0xff] %vm1090_vm3, %v1048_v8 }
 0x272   : > { %v1050_v9 = vpop.f32.mrf.mxu2 }
 0x273   : > { %v1051_v10 = vadd.f32 %v1973_v57, %v1050_v9  ;;  %v1193_v9 = vld [vmem:[#allocation2 + $0xd] ss:$40 sm:$0xf] }
 0x275   : > { %1115 = vst.msk [vmem:[#allocation2 + $0xc0] sm:$0xff] %vm1090_vm3, %v1051_v10 }
 0x27a   : > { %v1052_v55 = vpop.f32.mrf.mxu2 }
 0x27b   : > { %v1053_v11 = vadd.f32 %v1973_v57, %v1052_v55  ;;  %v1167_v55 = vld [vmem:[#allocation2 + $0x9] ss:$40 sm:$0xf] }
 0x27d   : > { %1116 = vst.msk [vmem:[#allocation2 + $0xc8] sm:$0xff] %vm1090_vm3, %v1053_v11 }
 0x282   : > { %v1055_v12 = vpop.f32.mrf.mxu2 }
 0x283   : > { %v1056_v13 = vadd.f32 %v1973_v57, %v1055_v12 }
 0x285   : > { %1117 = vst.msk [vmem:[#allocation2 + $0xd0] sm:$0xff] %vm1090_vm3, %v1056_v13 }
 0x28a   : > { %v1057_v14 = vpop.f32.mrf.mxu2 }
 0x28b   : > { %v1058_v15 = vadd.f32 %v1973_v57, %v1057_v14 }
 0x28d   : > { %1118 = vst.msk [vmem:[#allocation2 + $0xd8] sm:$0xff] %vm1090_vm3, %v1058_v15 }
 0x292   : > { %v1060_v16 = vpop.f32.mrf.mxu3 }
 0x293   : > { %v1061_v17 = vadd.f32 %v1973_v57, %v1060_v16 }
 0x295   : > { %1119 = vst.msk [vmem:[#allocation2 + $0xe0] sm:$0xff] %vm1090_vm3, %v1061_v17 }
 0x29a   : > { %v1062_v18 = vpop.f32.mrf.mxu3 }
 0x29b   : > { %v1063_v19 = vadd.f32 %v1973_v57, %v1062_v18 }
 0x29d   : > { %1120 = vst.msk [vmem:[#allocation2 + $0xe8] sm:$0xff] %vm1090_vm3, %v1063_v19 }
 0x2a8   : > { %v1065_v20 = vpop.f32.mrf.mxu3 }
 0x2a9   : > { %v1066_v21 = vadd.f32 %v1973_v57, %v1065_v20 }
 0x2ab   : > { %1121 = vst.msk [vmem:[#allocation2 + $0xf0] sm:$0xff] %vm1090_vm3, %v1066_v21 }
 0x2b0   : > { %v1067_v22 = vpop.f32.mrf.mxu3 }
 0x2b1   : > { %v1068_v24 = vadd.f32 %v1973_v57, %v1067_v22  ;;  %v1197_v22 = vld [vmem:[#allocation2 + $0xe] ss:$40 sm:$0xf] }
 0x2b3   : > { %1122 = vst.msk [vmem:[#allocation2 + $0xf8] sm:$0xff] %vm1090_vm3, %v1068_v24 }
 0x2b8   : > { %v1070_v25 = vpop.f32.mrf.mxu3 }
 0x2b9   : > { %v1071_v26 = vadd.f32 %v1973_v57, %v1070_v25 }
 0x2bb   : > { %1123 = vst.msk [vmem:[#allocation2 + $0x100] sm:$0xff] %vm1090_vm3, %v1071_v26 }
 0x2c0   : > { %v1072_v27 = vpop.f32.mrf.mxu3 }
 0x2c1   : > { %v1073_v28 = vadd.f32 %v1973_v57, %v1072_v27  ;;  %v1201_v27 = vld [vmem:[#allocation2 + $0xf] ss:$40 sm:$0xf] }
 0x2c3   : > { %1124 = vst.msk [vmem:[#allocation2 + $0x108] sm:$0xff] %vm1090_vm3, %v1073_v28 }
 0x2c8   : > { %v1075_v29 = vpop.f32.mrf.mxu3 }
 0x2c9   : > { %v1076_v30 = vadd.f32 %v1973_v57, %v1075_v29 }
 0x2cb   : > { %1125 = vst.msk [vmem:[#allocation2 + $0x110] sm:$0xff] %vm1090_vm3, %v1076_v30  ;;  %v1205_v30 = vld [vmem:[#allocation2 + $0x10] ss:$40 sm:$0xf] }
 0x2d0   : > { %v1077_v31 = vpop.f32.mrf.mxu3 }
 0x2d1   : > { %v1078_v32 = vadd.f32 %v1973_v57, %v1077_v31  ;;  %v1209_v31 = vld [vmem:[#allocation2 + $0x11] ss:$40 sm:$0xf] }
 0x2d3   : > { %1126 = vst.msk [vmem:[#allocation2 + $0x118] sm:$0xff] %vm1090_vm3, %v1078_v32 }
 0x2d8   : > { %v1080_v33 = vpop.f32.mrf.mxu3 }
 0x2d9   : > { %v1081_v23 = vadd.f32 %v1973_v57, %v1080_v33 }
 0x2da   : > { %v1132_v36 = vld [vmem:[#allocation2] ss:$40 sm:$0xf0]  ;;  %v1136_v37 = vld [vmem:[#allocation2 + $0x1] ss:$40 sm:$0xf0] }
 0x2db   : > { %1127 = vst.msk [vmem:[#allocation2 + $0x120] sm:$0xff] %vm1090_vm3, %v1081_v23  ;;  %v1140_v41 = vld [vmem:[#allocation2 + $0x2] ss:$40 sm:$0xf0]  ;;  %v1133_v46 = vor.u32 %v1132_v36, %v1131_v34  ;;  %v1137_v47 = vor.u32 %v1136_v37, %v1135_v35 }
 0x2dc   : > { %v1144_v44 = vld [vmem:[#allocation2 + $0x3] ss:$40 sm:$0xf0]  ;;  %v1148_v45 = vld [vmem:[#allocation2 + $0x4] ss:$40 sm:$0xf0]  ;;  %v1141_v50 = vor.u32 %v1140_v41, %v1139_v38 }
 0x2dd   : > { %v1152_v48 = vld [vmem:[#allocation2 + $0x5] ss:$40 sm:$0xf0]  ;;  %v1156_v49 = vld [vmem:[#allocation2 + $0x6] ss:$40 sm:$0xf0]  ;;  %v1145_v51 = vor.u32 %v1144_v44, %v1143_v39  ;;  %v1149_v52 = vor.u32 %v1148_v45, %v1147_v40  ;;  %v1170_v61 = vmax.f32 %v1133_v46, %v1137_v47 }
 0x2de   : > { %v1160_v53 = vld [vmem:[#allocation2 + $0x7] ss:$40 sm:$0xf0]  ;;  %v1153_v54 = vor.u32 %v1152_v48, %v1151_v42  ;;  %v1157_v56 = vor.u32 %v1156_v49, %v1155_v43  ;;  %v1213_v35 = vld [vmem:[#allocation2 + $0x12] ss:$40 sm:$0xf] }
 0x2df   : > { %v1161_v59 = vor.u32 %v1160_v53, %v1159_v58  ;;  %v1171_v63 = vmax.f32 %v1141_v50, %v1145_v51  ;;  %v1217_v36 = vld [vmem:[#allocation2 + $0x13] ss:$40 sm:$0xf]  ;;  %v1236_v49 = vld [vmem:[#allocation2 + $0x14] ss:$40 sm:$0xf] }
 0x2e0   : > { %v1082_v60 = vpop.f32.mrf.mxu3  ;;  %v1172_v0 = vmax.f32 %v1149_v52, %v1153_v54  ;;  %v1240_v50 = vld [vmem:[#allocation2 + $0x15] ss:$40 sm:$0xf]  ;;  %v1244_v58 = vld [vmem:[#allocation2 + $0x16] ss:$40 sm:$0xf] }
 0x2e1   : > { %v1083_v62 = vadd.f32 %v1973_v57, %v1082_v60  ;;  %v1173_v1 = vmax.f32 %v1157_v56, %v1161_v59  ;;  %v1175_v13 = vmax.f32 %v1170_v61, %v1171_v63  ;;  %v1248_v59 = vld [vmem:[#allocation2 + $0x17] ss:$40 sm:$0xf] }
 0x2e2   : > { %v1182_v2 = vld [vmem:[#allocation2 + $0xa] ss:$40 sm:$0xf0]  ;;  %v1186_v5 = vld [vmem:[#allocation2 + $0xb] ss:$40 sm:$0xf0] }
 0x2e3   : > { %1128 = vst.msk [vmem:[#allocation2 + $0x128] sm:$0xff] %vm1090_vm3, %v1083_v62  ;;  %v1190_v8 = vld [vmem:[#allocation2 + $0xc] ss:$40 sm:$0xf0]  ;;  %v1176_v14 = vmax.f32 %v1172_v0, %v1173_v1  ;;  %v1183_v15 = vor.u32 %v1182_v2, %v1181_v3  ;;  %v1187_v16 = vor.u32 %v1186_v5, %v1185_v4 }
 0x2e4   : > { %v1194_v10 = vld [vmem:[#allocation2 + $0xd] ss:$40 sm:$0xf0]  ;;  %v1198_v11 = vld [vmem:[#allocation2 + $0xe] ss:$40 sm:$0xf0]  ;;  %v1191_v20 = vor.u32 %v1190_v8, %v1189_v7 }
 0x2e5   : > { %v1164_v12 = vld [vmem:[#allocation2 + $0x8] ss:$40 sm:$0xf0]  ;;  %v1202_v17 = vld [vmem:[#allocation2 + $0xf] ss:$40 sm:$0xf0]  ;;  %v1195_v21 = vor.u32 %v1194_v10, %v1193_v9  ;;  %v1199_v26 = vor.u32 %v1198_v11, %v1197_v22  ;;  %v1177_v33 = vmax.f32 %v1175_v13, %v1176_v14  ;;  %v1220_v37 = vmax.f32 %v1183_v15, %v1187_v16 }
 0x2e6   : > { %v1168_v18 = vld [vmem:[#allocation2 + $0x9] ss:$40 sm:$0xf0]  ;;  %v1165_v19 = vor.u32 %v1164_v12, %v1163_v6  ;;  %v1203_v29 = vor.u32 %v1202_v17, %v1201_v27  ;;  %v1252_v0 = vld [vmem:[#allocation2 + $0x18] ss:$40 sm:$0xf] }
 0x2e7   : > { %v1169_v24 = vor.u32 %v1168_v18, %v1167_v55  ;;  %v1221_v41 = vmax.f32 %v1191_v20, %v1195_v21  ;;  %v1256_v1 = vld [vmem:[#allocation2 + $0x19] ss:$40 sm:$0xf]  ;;  %v1260_v6 = vld [vmem:[#allocation2 + $0x1a] ss:$40 sm:$0xf] }
 0x2e8   : > { %v1085_v25 = vpop.f32.mrf.mxu3  ;;  %v1222_v47 = vmax.f32 %v1199_v26, %v1203_v29  ;;  %v1264_v9 = vld [vmem:[#allocation2 + $0x1b] ss:$40 sm:$0xf]  ;;  %v1268_v15 = vld [vmem:[#allocation2 + $0x1c] ss:$40 sm:$0xf] }
 0x2e9   : > { %v1086_v28 = vadd.f32 %v1973_v57, %v1085_v25  ;;  %v1174_v32 = vmax.f32 %v1165_v19, %v1169_v24  ;;  %v1225_v54 = vmax.f32 %v1220_v37, %v1221_v41  ;;  %v1272_v22 = vld [vmem:[#allocation2 + $0x1d] ss:$40 sm:$0xf]  ;;  %v1295_v29 = vld [vmem:[#allocation2 + $0x1f] ss:$40 sm:$0xf] }
 0x2ea   : > { %v1206_v23 = vld [vmem:[#allocation2 + $0x10] ss:$40 sm:$0xf0]  ;;  %v1210_v34 = vld [vmem:[#allocation2 + $0x11] ss:$40 sm:$0xf0] }
 0x2eb   : > { %1129 = vst.msk [vmem:[#allocation2 + $0x130] sm:$0xff] %vm1090_vm3, %v1086_v28  ;;  %v1207_v38 = vor.u32 %v1206_v23, %v1205_v30  ;;  %v1211_v39 = vor.u32 %v1210_v34, %v1209_v31  ;;  %v1214_v40 = vld [vmem:[#allocation2 + $0x12] ss:$40 sm:$0xf0]  ;;  %v1178_v42 = vmax.f32 %v1177_v33, %v1174_v32 }
 0x2ec   : > { %v1218_v43 = vld [vmem:[#allocation2 + $0x13] ss:$40 sm:$0xf0]  ;;  %v1237_v44 = vld [vmem:[#allocation2 + $0x14] ss:$40 sm:$0xf0]  ;;  %v1215_v45 = vor.u32 %v1214_v40, %v1213_v35 }
 0x2ed   : > { %v1219_v46 = vor.u32 %v1218_v43, %v1217_v36  ;;  %v1223_v48 = vmax.f32 %v1207_v38, %v1211_v39  ;;  %v1241_v51 = vld [vmem:[#allocation2 + $0x15] ss:$40 sm:$0xf0]  ;;  %v1245_v52 = vld [vmem:[#allocation2 + $0x16] ss:$40 sm:$0xf0]  ;;  %v1238_v61 = vor.u32 %v1237_v44, %v1236_v49 }
 0x2ee   : > { %v1249_v53 = vld [vmem:[#allocation2 + $0x17] ss:$40 sm:$0xf0]  ;;  %1179 = vst.msk [vmem:[%s2085_s8] sm:$0xff] %vm1090_vm3, %v1178_v42  ;;  %v1242_v62 = vor.u32 %v1241_v51, %v1240_v50  ;;  %v1246_v63 = vor.u32 %v1245_v52, %v1244_v58 }
 0x2ef   : > { %v1226_v56 = vmax.f32 %v1222_v47, %v1223_v48  ;;  %v1224_v3 = vmax.f32 %v1215_v45, %v1219_v46  ;;  %v1250_v5 = vor.u32 %v1249_v53, %v1248_v59  ;;  %v1291_v28 = vld [vmem:[#allocation2 + $0x1e] ss:$40 sm:$0xf]  ;;  %v1299_v32 = vld [vmem:[#allocation2 + $0x20] ss:$40 sm:$0xf] }
 0x2f0   : > { %v1087_v60 = vpop.f32.mrf.mxu3  ;;  %v1275_v18 = vmax.f32 %v1238_v61, %v1242_v62  ;;  %v1303_v33 = vld [vmem:[#allocation2 + $0x21] ss:$40 sm:$0xf]  ;;  %v1307_v35 = vld [vmem:[#allocation2 + $0x22] ss:$40 sm:$0xf] }
 0x2f1   : > { %v1088_v2 = vadd.f32 %v1973_v57, %v1087_v60  ;;  %v1227_v4 = vmax.f32 %v1225_v54, %v1226_v56  ;;  %v1276_v19 = vmax.f32 %v1246_v63, %v1250_v5  ;;  %v1311_v36 = vld [vmem:[#allocation2 + $0x23] ss:$40 sm:$0xf]  ;;  %v1315_v39 = vld [vmem:[#allocation2 + $0x24] ss:$40 sm:$0xf] }
 0x2f2   : > { %v1253_v7 = vld [vmem:[#allocation2 + $0x18] ss:$40 sm:$0xf0]  ;;  %v1257_v8 = vld [vmem:[#allocation2 + $0x19] ss:$40 sm:$0xf0] }
 0x2f3   : > { %1130 = vst.msk [vmem:[#allocation2 + $0x138] sm:$0xff] %vm1090_vm3, %v1088_v2  ;;  %v1228_v10 = vmax.f32 %v1227_v4, %v1224_v3  ;;  %v1254_v55 = vor.u32 %v1253_v7, %v1252_v0  ;;  %v1258_v11 = vor.u32 %v1257_v8, %v1256_v1  ;;  %v1261_v12 = vld [vmem:[#allocation2 + $0x1a] ss:$40 sm:$0xf0]  ;;  %v1280_v23 = vmax.f32 %v1275_v18, %v1276_v19 }
 0x2f4   : > { %v1262_v13 = vor.u32 %v1261_v12, %v1260_v6  ;;  %v1265_v14 = vld [vmem:[#allocation2 + $0x1b] ss:$40 sm:$0xf0]  ;;  %v1269_v16 = vld [vmem:[#allocation2 + $0x1c] ss:$40 sm:$0xf0] }
 0x2f5   : > { %1230 = vrot.lane.b32.xlu0 %v1228_v10, %s1673_s9  ;;  %v1266_v57 = vor.u32 %v1265_v14, %v1264_v9  ;;  %v1273_v17 = vld [vmem:[#allocation2 + $0x1d] ss:$40 sm:$0xf0]  ;;  %v1277_v20 = vmax.f32 %v1254_v55, %v1258_v11  ;;  %v1292_v21 = vld [vmem:[#allocation2 + $0x1e] ss:$40 sm:$0xf0]  ;;  %v1270_v25 = vor.u32 %v1269_v16, %v1268_v15 }
 0x2f6   : > { %v1296_v24 = vld [vmem:[#allocation2 + $0x1f] ss:$40 sm:$0xf0]  ;;  %v1274_v26 = vor.u32 %v1273_v17, %v1272_v22  ;;  %v1293_v30 = vor.u32 %v1292_v21, %v1291_v28  ;;  %v1319_v40 = vld [vmem:[#allocation2 + $0x25] ss:$40 sm:$0xf] }
 0x2f7   : > { %v1278_v27 = vmax.f32 %v1262_v13, %v1266_v57  ;;  %v1297_v31 = vor.u32 %v1296_v24, %v1295_v29  ;;  %v1323_v60 = vld [vmem:[#allocation2 + $0x26] ss:$40 sm:$0xf]  ;;  %v1327_v61 = vld [vmem:[#allocation2 + $0x27] ss:$40 sm:$0xf] }
 0x2f8   : > { %v1279_v41 = vmax.f32 %v1270_v25, %v1274_v26 }
 0x2f9   : > { %v1281_v34 = vmax.f32 %v1277_v20, %v1278_v27  ;;  %v1330_v51 = vmax.f32 %v1293_v30, %v1297_v31 }
 0x2fa   : > { %v1300_v37 = vld [vmem:[#allocation2 + $0x20] ss:$40 sm:$0xf0]  ;;  %v1304_v38 = vld [vmem:[#allocation2 + $0x21] ss:$40 sm:$0xf0] }
 0x2fb   : > { %v1282_v42 = vmax.f32 %v1280_v23, %v1281_v34  ;;  %v1301_v43 = vor.u32 %v1300_v37, %v1299_v32  ;;  %v1305_v44 = vor.u32 %v1304_v38, %v1303_v33  ;;  %v1308_v45 = vld [vmem:[#allocation2 + $0x22] ss:$40 sm:$0xf0]  ;;  %v1312_v46 = vld [vmem:[#allocation2 + $0x23] ss:$40 sm:$0xf0] }
 0x2fc   : > { %v1309_v47 = vor.u32 %v1308_v45, %v1307_v35  ;;  %v1313_v48 = vor.u32 %v1312_v46, %v1311_v36  ;;  %v1316_v49 = vld [vmem:[#allocation2 + $0x24] ss:$40 sm:$0xf0]  ;;  %v1320_v50 = vld [vmem:[#allocation2 + $0x25] ss:$40 sm:$0xf0] }
 0x2fd   : > { %v1283_v52 = vmax.f32 %v1282_v42, %v1279_v41  ;;  %v1317_v53 = vor.u32 %v1316_v49, %v1315_v39  ;;  %v1321_v54 = vor.u32 %v1320_v50, %v1319_v40  ;;  %v1324_v56 = vld [vmem:[#allocation2 + $0x26] ss:$40 sm:$0xf0]  ;;  %v1328_v58 = vld [vmem:[#allocation2 + $0x27] ss:$40 sm:$0xf0]  ;;  %v1331_v59 = vmax.f32 %v1301_v43, %v1305_v44 }
 0x2fe   : > { %v1332_v62 = vmax.f32 %v1309_v47, %v1313_v48  ;;  %v1325_v63 = vor.u32 %v1324_v56, %v1323_v60  ;;  %v1329_v0 = vor.u32 %v1328_v58, %v1327_v61 }
 0x2ff   : > { %1285 = vrot.lane.b32.xlu0 %v1283_v52, %s1674_s13  ;;  %v1333_v1 = vmax.f32 %v1317_v53, %v1321_v54  ;;  %v1335_v2 = vmax.f32 %v1330_v51, %v1331_v59  ;;  %s1629_s13 = scalar_lea.hbm %s2135_s7, 16 }
 0x300   : > { %v1334_v4 = vmax.f32 %v1325_v63, %v1329_v0  ;;  %p1631_p1 = scmp.lt.s32.totalorder %s1629_s13, %s1625_s29 }
 0x301   : > { %v1336_v3 = vmax.f32 %v1332_v62, %v1333_v1 }
 0x302   : > { %p1632_p2 = por %p1631_p1, %p1630_p0 }
 0x303   : > { %v1337_v5 = vmax.f32 %v1335_v2, %v1336_v3 }
 0x304   : > { %p1633_p3 = pnand %p1632_p2, %p1628_p13 }
 0x305   : > { %v1338_v6 = vmax.f32 %v1337_v5, %v1334_v4 }
 0x307   : > { %1340 = vrot.lane.b32.xlu1 %v1338_v6, %s1675_s14 }
 0x367   : > { %v1231_v7 = vpop.permute.xlu0 %1230 }
 0x368   : > { %1234 = vst.msk [vmem:[%s2085_s8] sm:$0xff] %vm1233_vm4, %v1231_v7 }
 0x371   : > { %v1286_v8 = vpop.permute.xlu0 %1285 }
 0x372   : > { %1289 = vst.msk [vmem:[%s2085_s8] sm:$0xff] %vm1288_vm5, %v1286_v8 }
 0x379   : > { %v1341_v9 = vpop.permute.xlu1 %1340 }
 0x37a   : > { %1344 = vst.msk [vmem:[%s2085_s8] sm:$0xff] %vm1343_vm6, %v1341_v9 }
 0x37b   : > { %1636 = shalt.err (!%p1633_p3)
}
 0x37c   : > { %1564 = dma.vmem_to_hbm [thread:$0]  (%p1754_p5), %s1359_s20, 128, %s1361_s21, %s1346_s19  }
 0x37d PF: > { %p1570_p4 = scmp.ge.s32.totalorder %s1671_s27, 2  ;;  %s1372_s23 = sand.u32 1, %s1659_s24  }
 0x37e   : > { %s1373_s8 = scalar_lea.sflag [#allocation4], %s1372_s23 }
 0x37f   : > { %p1567_p7 = pnand %p1570_p4, %p1758_p6 }
 0x381   : > { %p1568_p8 = pneg %p1567_p7 }
 0x383   : > { %1654 = dma.done.wait (%p1568_p8), %s1373_s8, 128  }
 0x384   : > { %1656 = vsyncadd (%p1568_p8), %s1373_s8, 4294967168  ;;  %p17_p9 = scmp.ge.s32.totalorder %s1741_s30, 4   ;;  %s2138_s24 = smov %s1663_s25 }
 0x385   : > { %s2139_s25 = smov %s1667_s26  ;;  %s2140_s26 = smov %s1752_s10 }
 0x386   : > { %s2141_s27 = smov %s1741_s30  ;;  %19 = sbr.rel (!%p17_p9) target bundleno = 3 (0x3), region = 122 }
 0x38b   :  { %1379 = vsyncpa [#allocation4], 1 }
 0x38c   :  { %1381 = vsyncpa [#allocation4 + $0x1], 1 }

</bundles_post_ra>
